<compile_context>
chip_gen: v6e
topology: v6e:2x2x1
jax: 0.10.0
libtpu: 0.0.40
codegen_flags: <defaults>
</compile_context>

<pallas_src>
import jax
import jax.numpy as jnp
from jax.experimental import pallas as pl
from jax.experimental.pallas import tpu as pltpu


LANE = 128
D_IN = 28 * 28                       # 784 (divisible by 8 -> legal full block)

# Torch layer dims (fan_in, fan_out) for the encoder.
ENC_DIMS = [(D_IN, 128), (128, 64), (64, 12), (12, 3)]
DEC_DIMS = [(3, 12), (12, 64), (64, 128), (128, D_IN)]


def _round_up(n, m):
    return ((n + m - 1) // m) * m


def _cdiv(a, b):
    return -(-a // b)


def _pad2(a, rows, cols):
    out = jnp.zeros((rows, cols), a.dtype)
    return out.at[: a.shape[0], : a.shape[1]].set(a)


# ----------------------------------------------------------------------------
# Pallas kernel: full autoencoder forward on one batch tile.
#   x_ref    : (tile_b, 784)  f32
#   we1_ref  : (784, 128)     compute dtype (f32 or bf16)
#   wmid_ref : (6, 128, 128)  compute dtype  [enc1, enc2, enc3, dec0, dec1, dec2]
#   wd4_ref  : (128, 784)     compute dtype
#   bias_ref : (8, 128)       f32  [enc_b0..3, dec_b0..2, unused]
#   bd4_ref  : (1, 784)       f32  [dec_b3]
#   enc_ref  : (tile_b, 128)  f32  (lanes 3..127 are zero)
#   dec_ref  : (tile_b, 784)  f32
# ----------------------------------------------------------------------------
def _ae_kernel(x_ref, we1_ref, wmid_ref, wd4_ref, bias_ref, bd4_ref,
               enc_ref, dec_ref):
    f32 = jnp.float32
    cdt = we1_ref.dtype                                  # MXU input dtype
    b = bias_ref[...]                                    # (8, 128) f32

    # ---------------- encoder ----------------
    x = x_ref[...].astype(cdt)
    h = jnp.maximum(jnp.dot(x, we1_ref[...], preferred_element_type=f32)
                    + b[0:1, :], 0.0)
    h = jnp.maximum(jnp.dot(h.astype(cdt), wmid_ref[0], preferred_element_type=f32)
                    + b[1:2, :], 0.0)
    h = jnp.maximum(jnp.dot(h.astype(cdt), wmid_ref[1], preferred_element_type=f32)
                    + b[2:3, :], 0.0)
    enc = jnp.dot(h.astype(cdt), wmid_ref[2], preferred_element_type=f32) + b[3:4, :]
    enc_ref[...] = enc.astype(enc_ref.dtype)

    # -------- decoder (weights = pseudo-inverses of encoder weights) --------
    d = jnp.maximum(jnp.dot(enc.astype(cdt), wmid_ref[3], preferred_element_type=f32)
                    + b[4:5, :], 0.0)
    d = jnp.maximum(jnp.dot(d.astype(cdt), wmid_ref[4], preferred_element_type=f32)
                    + b[5:6, :], 0.0)
    d = jnp.maximum(jnp.dot(d.astype(cdt), wmid_ref[5], preferred_element_type=f32)
                    + b[6:7, :], 0.0)
    dec = jnp.tanh(jnp.dot(d.astype(cdt), wd4_ref[...], preferred_element_type=f32)
                   + bd4_ref[...])
    dec_ref[...] = dec.astype(dec_ref.dtype)


# ----------------------------------------------------------------------------
# Pseudo-inverse (matches the torch.svd-based get_pseudo_inverse: invert only
# the non-zero singular values, no rcond thresholding).
# ----------------------------------------------------------------------------
def pseudo_inverse(a):
    # TODO(synk): SVD has no Pallas equivalent; computed once in plain JAX (XLA).
    u, s, vh = jnp.linalg.svd(a, full_matrices=False)
    s_inv = jnp.where(s != 0, 1.0 / s, 0.0)
    return (vh.T * s_inv[None, :]) @ u.T


# ----------------------------------------------------------------------------
# Parameter construction (deterministic, mimics nn.Linear default init ranges)
# ----------------------------------------------------------------------------
def init_params(key):
    params = {}
    for i, (fan_in, fan_out) in enumerate(ENC_DIMS):
        key, kw, kb = jax.random.split(key, 3)
        bound = 1.0 / jnp.sqrt(fan_in)
        params[f"enc_w{i}"] = jax.random.uniform(
            kw, (fan_out, fan_in), jnp.float32, -bound, bound)
        params[f"enc_b{i}"] = jax.random.uniform(
            kb, (fan_out,), jnp.float32, -bound, bound)
    # Decoder weights are overwritten with pseudo-inverses every forward in the
    # torch module, so only decoder biases are free parameters.
    for i, (fan_in, fan_out) in enumerate(DEC_DIMS):
        key, kb = jax.random.split(key)
        bound = 1.0 / jnp.sqrt(fan_in)
        params[f"dec_b{i}"] = jax.random.uniform(
            kb, (fan_out,), jnp.float32, -bound, bound)
    return params


# ----------------------------------------------------------------------------
# One-time setup: kernel-ready weights (transposed, minimally padded, packed).
# Encoder weights are static at inference, so the per-forward SVDs of the torch
# module are hoisted here (identical results).
# compute_dtype=jnp.bfloat16 enables the fast MXU path (f32 accumulation).
# ----------------------------------------------------------------------------
def prepare_kernel_params(params, compute_dtype=jnp.float32):
    f32 = jnp.float32

    # Layer 1: (784, 128) — unpadded, lane-dense.
    we1 = params["enc_w0"].astype(f32).T

    # Middle layers, zero-padded to (128, 128) and stacked into one array.
    mids = []
    for i in (1, 2, 3):                                   # encoder layers 2-4
        mids.append(_pad2(params[f"enc_w{i}"].astype(f32).T, LANE, LANE))
    for i in (0, 1, 2):                                   # decoder layers 1-3
        w = pseudo_inverse(params[f"enc_w{3 - i}"].astype(f32)).T
        mids.append(_pad2(w, LANE, LANE))
    w_mid = jnp.stack(mids, axis=0)                       # (6, 128, 128)

    # Last decoder layer: pinv(enc_w0).T -> (128, 784), unpadded.
    wd4 = pseudo_inverse(params["enc_w0"].astype(f32)).T

    # Biases: rows 0-3 encoder, rows 4-6 decoder layers 1-3, row 7 unused.
    rows = [_pad2(params[f"enc_b{i}"].astype(f32).reshape(1, -1), 1, LANE)
            for i in range(4)]
    rows += [_pad2(params[f"dec_b{i}"].astype(f32).reshape(1, -1), 1, LANE)
             for i in range(3)]
    rows += [jnp.zeros((1, LANE), f32)]
    bias = jnp.concatenate(rows, axis=0)                  # (8, 128)
    bd4 = params["dec_b3"].astype(f32).reshape(1, -1)     # (1, 784)

    cdt = compute_dtype
    return {"we1": we1.astype(cdt), "w_mid": w_mid.astype(cdt),
            "wd4": wd4.astype(cdt), "bias": bias, "bd4": bd4}


# ----------------------------------------------------------------------------
# Forward: batch-tiled pallas_call with resident weights.
# ----------------------------------------------------------------------------
def autoencoder_forward(x, kparams, max_tile_b=1024):
    f32 = jnp.float32
    B = x.shape[0]

    # Round the batch up to a multiple of 8 only; keep >=2 grid steps when
    # possible so "parallel" can shard across v7x's two TensorCores.
    B8 = _round_up(max(B, 1), 8)
    n_tiles = max(2 if B8 >= 16 else 1, _cdiv(B8, max_tile_b))
    tile_b = _round_up(_cdiv(B8, n_tiles), 8)
    n_tiles = _cdiv(B8, tile_b)
    Bp = n_tiles * tile_b

    xf = x.astype(f32)
    if Bp != B:                       # small batch-only pad (no lane padding)
        xf = jnp.pad(xf, ((0, Bp - B), (0, 0)))

    we1, w_mid, wd4 = kparams["we1"], kparams["w_mid"], kparams["wd4"]
    bias, bd4 = kparams["bias"], kparams["bd4"]

    def resident(a):
        # Full-array block, constant index_map: fetched once, stays in VMEM.
        zeros = (0,) * a.ndim
        return pl.BlockSpec(a.shape, lambda i: zeros)

    in_specs = [pl.BlockSpec((tile_b, D_IN), lambda i: (i, 0)),
                resident(we1), resident(w_mid), resident(wd4),
                resident(bias), resident(bd4)]
    out_specs = (pl.BlockSpec((tile_b, LANE), lambda i: (i, 0)),
                 pl.BlockSpec((tile_b, D_IN), lambda i: (i, 0)))

    enc_p, dec_p = pl.pallas_call(
        _ae_kernel,
        out_shape=(jax.ShapeDtypeStruct((Bp, LANE), f32),
                   jax.ShapeDtypeStruct((Bp, D_IN), f32)),
        grid=(n_tiles,),
        in_specs=in_specs,
        out_specs=out_specs,
        compiler_params=pltpu.CompilerParams(
            dimension_semantics=("parallel",),
            vmem_limit_bytes=32 << 20),
    )(xf, we1, w_mid, wd4, bias, bd4)

    enc = enc_p[:B, :3]
    dec = dec_p if Bp == B else dec_p[:B]
    return enc, dec


# ----------------------------------------------------------------------------
# Pure-JAX reference (torch semantics). compute_dtype mirrors the kernel's
# optional bf16 MXU-input path (f32 accumulation, f32 biases).
# ----------------------------------------------------------------------------
def reference_forward(x, params, compute_dtype=jnp.float32):
    f32 = jnp.float32
    cdt = compute_dtype

    def lin(v, w_t, bias):
        return jnp.dot(v.astype(cdt), w_t.astype(cdt),
                       preferred_element_type=f32) + bias.astype(f32)

    h = x.astype(f32)
    for i in range(3):
        h = jnp.maximum(lin(h, params[f"enc_w{i}"].astype(f32).T,
                            params[f"enc_b{i}"]), 0.0)
    enc = lin(h, params["enc_w3"].astype(f32).T, params["enc_b3"])

    d = enc
    for i in range(3):
        w = pseudo_inverse(params[f"enc_w{3 - i}"].astype(f32))
        d = jnp.maximum(lin(d, w.T, params[f"dec_b{i}"]), 0.0)
    w = pseudo_inverse(params["enc_w0"].astype(f32))
    dec = jnp.tanh(lin(d, w.T, params["dec_b3"]))
    return enc, dec


if __name__ == "__main__":
    key = jax.random.PRNGKey(0)
    key, kx = jax.random.split(key)
    params = init_params(key)

    B = 16
    x = jax.random.normal(kx, (B, D_IN), jnp.float32)

    # ---------- f32 path (exact torch semantics) ----------
    kparams = prepare_kernel_params(params)          # one-time SVDs + packing
    enc, dec = autoencoder_forward(x, kparams)       # grid of 2 batch tiles
    jax.block_until_ready((enc, dec))

    enc_ref, dec_ref = reference_forward(x, params)
    assert enc.shape == (B, 3) and dec.shape == (B, D_IN)
    assert jnp.allclose(enc, enc_ref, atol=2e-4, rtol=2e-4)
    assert jnp.allclose(dec, dec_ref, atol=2e-4, rtol=2e-4)

    # ---------- bf16 MXU-input path (perf option for v6e/v7x) ----------
    kparams_bf = prepare_kernel_params(params, compute_dtype=jnp.bfloat16)
    enc_bf, dec_bf = autoencoder_forward(x, kparams_bf)
    jax.block_until_ready((enc_bf, dec_bf))

    enc_ref_bf, dec_ref_bf = reference_forward(x, params, jnp.bfloat16)
    assert jnp.allclose(enc_bf, enc_ref_bf, atol=2e-2, rtol=2e-2)
    assert jnp.allclose(dec_bf, dec_ref_bf, atol=2e-2, rtol=2e-2)

    print("KERNEL_OK")
</pallas_src>

<mosaic_0001>
module attributes {stable_mosaic.version = 11 : i64} {
  func.func @_ae_kernel(%arg0: i32, %arg1: memref<8x784xf32, #tpu.memory_space<vmem>>, %arg2: memref<784x128xf32, #tpu.memory_space<vmem>>, %arg3: memref<6x128x128xf32, #tpu.memory_space<vmem>>, %arg4: memref<128x784xf32, #tpu.memory_space<vmem>>, %arg5: memref<8x128xf32, #tpu.memory_space<vmem>>, %arg6: memref<1x784xf32, #tpu.memory_space<vmem>>, %arg7: memref<8x128xf32, #tpu.memory_space<vmem>>, %arg8: memref<8x784xf32, #tpu.memory_space<vmem>>) attributes {dimension_semantics = [#tpu.dimension_semantics<parallel>], iteration_bounds = array<i64: 2>, scalar_prefetch = 0 : i64, scratch_operands = 0 : i64, tpu.core_type = #tpu.core_type<tc>, window_params = [{transform_indices = @transform_0, window_bounds = array<i64: 8, 784>}, {pipeline_mode = #tpu.pipeline_mode<synchronous>, transform_indices = @transform_1, window_bounds = array<i64: 784, 128>}, {pipeline_mode = #tpu.pipeline_mode<synchronous>, transform_indices = @transform_2, window_bounds = array<i64: 6, 128, 128>}, {pipeline_mode = #tpu.pipeline_mode<synchronous>, transform_indices = @transform_3, window_bounds = array<i64: 128, 784>}, {pipeline_mode = #tpu.pipeline_mode<synchronous>, transform_indices = @transform_4, window_bounds = array<i64: 8, 128>}, {pipeline_mode = #tpu.pipeline_mode<synchronous>, transform_indices = @transform_5, window_bounds = array<i64: 1, 784>}, {transform_indices = @transform_6, window_bounds = array<i64: 8, 128>}, {transform_indices = @transform_7, window_bounds = array<i64: 8, 784>}]} {
    %c0 = arith.constant 0 : index
    %c0_0 = arith.constant 0 : index
    %0 = vector.load %arg5[%c0, %c0_0] : memref<8x128xf32, #tpu.memory_space<vmem>>, vector<8x128xf32>
    %c0_1 = arith.constant 0 : index
    %c0_2 = arith.constant 0 : index
    %1 = vector.load %arg1[%c0_1, %c0_2] : memref<8x784xf32, #tpu.memory_space<vmem>>, vector<8x784xf32>
    %c0_3 = arith.constant 0 : index
    %c0_4 = arith.constant 0 : index
    %2 = vector.load %arg2[%c0_3, %c0_4] : memref<784x128xf32, #tpu.memory_space<vmem>>, vector<784x128xf32>
    %cst = arith.constant dense<0.000000e+00> : vector<8x128xf32>
    %3 = tpu.matmul %1, %2, %cst {dimension_numbers = #tpu.dot_dimension_numbers<[1], [0], [0], [1], [0, 0, 1, 1], [], []>} : vector<8x784xf32>, vector<784x128xf32>, vector<8x128xf32> -> vector<8x128xf32>
    %4 = vector.extract_strided_slice %0 {offsets = [0, 0], sizes = [1, 128], strides = [1, 1]} : vector<8x128xf32> to vector<1x128xf32>
    %5 = vector.broadcast %4 : vector<1x128xf32> to vector<8x128xf32>
    %6 = arith.addf %3, %5 : vector<8x128xf32>
    %cst_5 = arith.constant 0.000000e+00 : f32
    %7 = vector.broadcast %cst_5 : f32 to vector<8x128xf32>
    %8 = arith.maximumf %6, %7 : vector<8x128xf32>
    %c0_6 = arith.constant 0 : index
    %c0_7 = arith.constant 0 : index
    %c0_8 = arith.constant 0 : index
    %9 = vector.load %arg3[%c0_6, %c0_7, %c0_8] : memref<6x128x128xf32, #tpu.memory_space<vmem>>, vector<1x128x128xf32>
    %10 = vector.shape_cast %9 : vector<1x128x128xf32> to vector<128x128xf32>
    %cst_9 = arith.constant dense<0.000000e+00> : vector<8x128xf32>
    %11 = tpu.matmul %8, %10, %cst_9 {dimension_numbers = #tpu.dot_dimension_numbers<[1], [0], [0], [1], [0, 0, 1, 1], [], []>} : vector<8x128xf32>, vector<128x128xf32>, vector<8x128xf32> -> vector<8x128xf32>
    %12 = vector.extract_strided_slice %0 {offsets = [1, 0], sizes = [1, 128], strides = [1, 1]} : vector<8x128xf32> to vector<1x128xf32>
    %13 = vector.broadcast %12 : vector<1x128xf32> to vector<8x128xf32>
    %14 = arith.addf %11, %13 : vector<8x128xf32>
    %cst_10 = arith.constant 0.000000e+00 : f32
    %15 = vector.broadcast %cst_10 : f32 to vector<8x128xf32>
    %16 = arith.maximumf %14, %15 : vector<8x128xf32>
    %c1 = arith.constant 1 : index
    %c0_11 = arith.constant 0 : index
    %c0_12 = arith.constant 0 : index
    %17 = vector.load %arg3[%c1, %c0_11, %c0_12] : memref<6x128x128xf32, #tpu.memory_space<vmem>>, vector<1x128x128xf32>
    %18 = vector.shape_cast %17 : vector<1x128x128xf32> to vector<128x128xf32>
    %cst_13 = arith.constant dense<0.000000e+00> : vector<8x128xf32>
    %19 = tpu.matmul %16, %18, %cst_13 {dimension_numbers = #tpu.dot_dimension_numbers<[1], [0], [0], [1], [0, 0, 1, 1], [], []>} : vector<8x128xf32>, vector<128x128xf32>, vector<8x128xf32> -> vector<8x128xf32>
    %20 = vector.extract_strided_slice %0 {offsets = [2, 0], sizes = [1, 128], strides = [1, 1]} : vector<8x128xf32> to vector<1x128xf32>
    %21 = vector.broadcast %20 : vector<1x128xf32> to vector<8x128xf32>
    %22 = arith.addf %19, %21 : vector<8x128xf32>
    %cst_14 = arith.constant 0.000000e+00 : f32
    %23 = vector.broadcast %cst_14 : f32 to vector<8x128xf32>
    %24 = arith.maximumf %22, %23 : vector<8x128xf32>
    %c2 = arith.constant 2 : index
    %c0_15 = arith.constant 0 : index
    %c0_16 = arith.constant 0 : index
    %25 = vector.load %arg3[%c2, %c0_15, %c0_16] : memref<6x128x128xf32, #tpu.memory_space<vmem>>, vector<1x128x128xf32>
    %26 = vector.shape_cast %25 : vector<1x128x128xf32> to vector<128x128xf32>
    %cst_17 = arith.constant dense<0.000000e+00> : vector<8x128xf32>
    %27 = tpu.matmul %24, %26, %cst_17 {dimension_numbers = #tpu.dot_dimension_numbers<[1], [0], [0], [1], [0, 0, 1, 1], [], []>} : vector<8x128xf32>, vector<128x128xf32>, vector<8x128xf32> -> vector<8x128xf32>
    %28 = vector.extract_strided_slice %0 {offsets = [3, 0], sizes = [1, 128], strides = [1, 1]} : vector<8x128xf32> to vector<1x128xf32>
    %29 = vector.broadcast %28 : vector<1x128xf32> to vector<8x128xf32>
    %30 = arith.addf %27, %29 : vector<8x128xf32>
    %c0_18 = arith.constant 0 : index
    %c0_19 = arith.constant 0 : index
    %31 = vector.load %arg7[%c0_18, %c0_19] : memref<8x128xf32, #tpu.memory_space<vmem>>, vector<8x128xf32>
    tpu.vector_store %arg7[%c0_18, %c0_19], %30 {strides = array<i32>} : memref<8x128xf32, #tpu.memory_space<vmem>>, vector<8x128xf32>,
    %c3 = arith.constant 3 : index
    %c0_20 = arith.constant 0 : index
    %c0_21 = arith.constant 0 : index
    %32 = vector.load %arg3[%c3, %c0_20, %c0_21] : memref<6x128x128xf32, #tpu.memory_space<vmem>>, vector<1x128x128xf32>
    %33 = vector.shape_cast %32 : vector<1x128x128xf32> to vector<128x128xf32>
    %cst_22 = arith.constant dense<0.000000e+00> : vector<8x128xf32>
    %34 = tpu.matmul %30, %33, %cst_22 {dimension_numbers = #tpu.dot_dimension_numbers<[1], [0], [0], [1], [0, 0, 1, 1], [], []>} : vector<8x128xf32>, vector<128x128xf32>, vector<8x128xf32> -> vector<8x128xf32>
    %35 = vector.extract_strided_slice %0 {offsets = [4, 0], sizes = [1, 128], strides = [1, 1]} : vector<8x128xf32> to vector<1x128xf32>
    %36 = vector.broadcast %35 : vector<1x128xf32> to vector<8x128xf32>
    %37 = arith.addf %34, %36 : vector<8x128xf32>
    %cst_23 = arith.constant 0.000000e+00 : f32
    %38 = vector.broadcast %cst_23 : f32 to vector<8x128xf32>
    %39 = arith.maximumf %37, %38 : vector<8x128xf32>
    %c4 = arith.constant 4 : index
    %c0_24 = arith.constant 0 : index
    %c0_25 = arith.constant 0 : index
    %40 = vector.load %arg3[%c4, %c0_24, %c0_25] : memref<6x128x128xf32, #tpu.memory_space<vmem>>, vector<1x128x128xf32>
    %41 = vector.shape_cast %40 : vector<1x128x128xf32> to vector<128x128xf32>
    %cst_26 = arith.constant dense<0.000000e+00> : vector<8x128xf32>
    %42 = tpu.matmul %39, %41, %cst_26 {dimension_numbers = #tpu.dot_dimension_numbers<[1], [0], [0], [1], [0, 0, 1, 1], [], []>} : vector<8x128xf32>, vector<128x128xf32>, vector<8x128xf32> -> vector<8x128xf32>
    %43 = vector.extract_strided_slice %0 {offsets = [5, 0], sizes = [1, 128], strides = [1, 1]} : vector<8x128xf32> to vector<1x128xf32>
    %44 = vector.broadcast %43 : vector<1x128xf32> to vector<8x128xf32>
    %45 = arith.addf %42, %44 : vector<8x128xf32>
    %cst_27 = arith.constant 0.000000e+00 : f32
    %46 = vector.broadcast %cst_27 : f32 to vector<8x128xf32>
    %47 = arith.maximumf %45, %46 : vector<8x128xf32>
    %c5 = arith.constant 5 : index
    %c0_28 = arith.constant 0 : index
    %c0_29 = arith.constant 0 : index
    %48 = vector.load %arg3[%c5, %c0_28, %c0_29] : memref<6x128x128xf32, #tpu.memory_space<vmem>>, vector<1x128x128xf32>
    %49 = vector.shape_cast %48 : vector<1x128x128xf32> to vector<128x128xf32>
    %cst_30 = arith.constant dense<0.000000e+00> : vector<8x128xf32>
    %50 = tpu.matmul %47, %49, %cst_30 {dimension_numbers = #tpu.dot_dimension_numbers<[1], [0], [0], [1], [0, 0, 1, 1], [], []>} : vector<8x128xf32>, vector<128x128xf32>, vector<8x128xf32> -> vector<8x128xf32>
    %51 = vector.extract_strided_slice %0 {offsets = [6, 0], sizes = [1, 128], strides = [1, 1]} : vector<8x128xf32> to vector<1x128xf32>
    %52 = vector.broadcast %51 : vector<1x128xf32> to vector<8x128xf32>
    %53 = arith.addf %50, %52 : vector<8x128xf32>
    %cst_31 = arith.constant 0.000000e+00 : f32
    %54 = vector.broadcast %cst_31 : f32 to vector<8x128xf32>
    %55 = arith.maximumf %53, %54 : vector<8x128xf32>
    %c0_32 = arith.constant 0 : index
    %c0_33 = arith.constant 0 : index
    %56 = vector.load %arg4[%c0_32, %c0_33] : memref<128x784xf32, #tpu.memory_space<vmem>>, vector<128x784xf32>
    %cst_34 = arith.constant dense<0.000000e+00> : vector<8x784xf32>
    %57 = tpu.matmul %55, %56, %cst_34 {dimension_numbers = #tpu.dot_dimension_numbers<[1], [0], [0], [1], [0, 0, 1, 1], [], []>} : vector<8x128xf32>, vector<128x784xf32>, vector<8x784xf32> -> vector<8x784xf32>
    %c0_35 = arith.constant 0 : index
    %c0_36 = arith.constant 0 : index
    %58 = vector.load %arg6[%c0_35, %c0_36] : memref<1x784xf32, #tpu.memory_space<vmem>>, vector<1x784xf32>
    %59 = vector.broadcast %58 : vector<1x784xf32> to vector<8x784xf32>
    %60 = arith.addf %57, %59 : vector<8x784xf32>
    %61 = math.tanh %60 : vector<8x784xf32>
    %c0_37 = arith.constant 0 : index
    %c0_38 = arith.constant 0 : index
    %62 = vector.load %arg8[%c0_37, %c0_38] : memref<8x784xf32, #tpu.memory_space<vmem>>, vector<8x784xf32>
    tpu.vector_store %arg8[%c0_37, %c0_38], %61 {strides = array<i32>} : memref<8x784xf32, #tpu.memory_space<vmem>>, vector<8x784xf32>,
    return
  }
  func.func @transform_0(%arg0: i32) -> (i32, i32) {
    %c0_i32 = arith.constant 0 : i32
    %c0_i32_0 = arith.constant 0 : i32
    return %arg0, %c0_i32 : i32, i32
  }
  func.func @transform_1(%arg0: i32) -> (i32, i32) {
    %c0_i32 = arith.constant 0 : i32
    %c0_i32_0 = arith.constant 0 : i32
    %c0_i32_1 = arith.constant 0 : i32
    return %c0_i32, %c0_i32_0 : i32, i32
  }
  func.func @transform_2(%arg0: i32) -> (i32, i32, i32) {
    %c0_i32 = arith.constant 0 : i32
    %c0_i32_0 = arith.constant 0 : i32
    %c0_i32_1 = arith.constant 0 : i32
    %c0_i32_2 = arith.constant 0 : i32
    return %c0_i32, %c0_i32_0, %c0_i32_1 : i32, i32, i32
  }
  func.func @transform_3(%arg0: i32) -> (i32, i32) {
    %c0_i32 = arith.constant 0 : i32
    %c0_i32_0 = arith.constant 0 : i32
    %c0_i32_1 = arith.constant 0 : i32
    return %c0_i32, %c0_i32_0 : i32, i32
  }
  func.func @transform_4(%arg0: i32) -> (i32, i32) {
    %c0_i32 = arith.constant 0 : i32
    %c0_i32_0 = arith.constant 0 : i32
    %c0_i32_1 = arith.constant 0 : i32
    return %c0_i32, %c0_i32_0 : i32, i32
  }
  func.func @transform_5(%arg0: i32) -> (i32, i32) {
    %c0_i32 = arith.constant 0 : i32
    %c0_i32_0 = arith.constant 0 : i32
    %c0_i32_1 = arith.constant 0 : i32
    return %c0_i32, %c0_i32_0 : i32, i32
  }
  func.func @transform_6(%arg0: i32) -> (i32, i32) {
    %c0_i32 = arith.constant 0 : i32
    %c0_i32_0 = arith.constant 0 : i32
    return %arg0, %c0_i32 : i32, i32
  }
  func.func @transform_7(%arg0: i32) -> (i32, i32) {
    %c0_i32 = arith.constant 0 : i32
    %c0_i32_0 = arith.constant 0 : i32
    return %arg0, %c0_i32 : i32, i32
  }
}

</mosaic_0001>

<bundles_post_ra>
// kernel: tpu_custom_call.1
= control target key start
LH: loop header
LB: loop body
LE: loop exit
PB: predicated region body
PF: predicated region fallthrough
CT: control target
= control target key end

     0   :  { %13 = vsyncpa [#allocation3], 0  ;;  %s3824_s0 = inlined_call_operand.vmem [shape: f32[16,784], index: 0, kind: input, shape index: {}]   ;;  %s3825_s1 = inlined_call_operand.vmem [shape: f32[784,128], index: 1, kind: input, shape index: {}]   ;;  %s3826_s2 = inlined_call_operand.vmem [shape: f32[6,128,128], index: 2, kind: input, shape index: {}]   ;;  %s3827_s3 = inlined_call_operand.vmem [shape: f32[128,784], index: 3, kind: input, shape index: {}]   ;;  %s3828_s4 = inlined_call_operand.vmem [shape: f32[8,128], index: 4, kind: input, shape index: {}]   ;;  %s3829_s5 = inlined_call_operand.vmem [shape: f32[1,784], index: 5, kind: input, shape index: {}]   ;;  %s3830_s6 = inlined_call_operand.hbm [shape: f32[16,128], index: 6, kind: output, shape index: {0}]   ;;  %s3831_s7 = inlined_call_operand.hbm [shape: f32[16,784], index: 7, kind: output, shape index: {1}]  }
   0x1   :  { %15 = vsyncpa [#allocation3 + $0x1], 0 }
   0x2   :  { %16 = vsyncpa [#allocation5], 0 }
   0x3   :  { %18 = vsyncpa [#allocation5 + $0x1], 0  ;;  %s2574_s24 = smov 0   ;;  %s2576_s25 = smov 0  }
   0x4   :  { %s2578_s26 = smov 0   ;;  %s2580_s27 = smov 0  }
   0x5 LB: > { %s2595_s28 = sadd.s32 4294967295, %s2528_s27   ;;  %s1804_s29 = sadd.s32 4294967294, %s2528_s27   ;;  %s2528_s27 = sphi %s2580_s27, %s3837_s27   ;;  %s2524_s26 = sphi %s2578_s26, %s3836_s26   ;;  %s2520_s25 = sphi %s2576_s25, %s3835_s25   ;;  %s2516_s24 = sphi %s2574_s24, %s3834_s24  }
   0x6   : > { %s2599_s30 = sadd.s32 1, %s2528_s27   ;;  %s162_s8 = sadd.s32 1, %s2524_s26 }
   0x7   : > { %s159_s9 = ssub.s32 %s2528_s27, %s2599_s30  ;;  %p172_p0 = scmp.ne.s32.totalorder %s2524_s26, %s2520_s25 }
   0x8   : > { %p160_p1 = scmp.eq.s32.totalorder %s159_s9, 0  ;;  %p173_p2 = scmp.eq.s32.totalorder %s2595_s28, 1 }
   0x9   : > { %p178_p3 = scmp.ne.s32.totalorder %s2520_s25, %s2516_s24  ;;  %p179_p4 = scmp.eq.s32.totalorder %s1804_s29, 1 }
   0xa   : > { %s2610_s10 = scalar_select %p160_p1, %s2524_s26, %s162_s8  }
   0xb   : > { %p2612_p5 = por %p173_p2, %p172_p0  ;;  %p2616_p6 = por %p179_p4, %p178_p3 }
   0xc   : > { %p1807_p7 = scmp.ge.s32.totalorder %s2528_s27, 1  ;;  %p246_p8 = scmp.lt.s32.totalorder %s2528_s27, 3 }
   0xe   : > { %p247_p9 = pnand %p1807_p7, %p246_p8 }
   0xf   : > { %p283_p10 = scmp.lt.s32.totalorder (!%p247_p9), %s2595_s28, 1  ;;  %s3281_s14 = sand.u32 (!%p247_p9), 1, %s2520_s25  }
  0x10   : > { %250 = sbr.rel (%p247_p9) target bundleno = 1728 (0x6c0), region = 44  ;;  %s1808_s15 = sshll.u32 (!%p247_p9), %s3281_s14, 3 }
  0x11   : > { %s1892_s13 = sshll.u32 (!%p247_p9), %s2595_s28, 7  ;;  %s2532_s22 = smov (!%p247_p9), [#allocation2]  }
  0x12   : > { %s1697_s18 = scalar_lea.hbm (!%p247_p9), %s3830_s6, %s1892_s13  ;;  %s2442_s23 = sshll.u32 (!%p247_p9), %s2532_s22, 4  ;;  %s2443_s23 = int_to_ptr.vmem [resolvable:$false] %s2442_s23 }
  0x15   : > { %v327_v0 = vld [vmem:[%s3825_s1 + $0xf8] sm:$0xff]  ;;  %v326_v2 = vld [vmem:[%s3825_s1 + $0xf0] sm:$0xff]  ;;  %v325_v6 = vld [vmem:[%s3825_s1 + $0xe8] sm:$0xff]  ;;  %s2743_s21 = scalar_select %p283_p10, %s2595_s28, 1  ;;  %vm398_vm0 = vcmask 130048   ;;  %vm2531_vm1 = vmmov 0  }
  0x16   : > { %v311_v1 = vld [vmem:[%s3825_s1 + $0x78] sm:$0xff]  ;;  %1896 = vmatprep.subr.mxu0 %v327_v0  ;;  %v310_v4 = vld [vmem:[%s3825_s1 + $0x70] sm:$0xff]  ;;  %v309_v8 = vld [vmem:[%s3825_s1 + $0x68] sm:$0xff] }
  0x17   : > { %v359_v3 = vld [vmem:[%s3825_s1 + $0x1f8] sm:$0xff]  ;;  %1897 = vmatpush3.msra.mxu0 %v311_v1  ;;  %v358_v7 = vld [vmem:[%s3825_s1 + $0x1f0] sm:$0xff]  ;;  %v357_v10 = vld [vmem:[%s3825_s1 + $0x1e8] sm:$0xff]  ;;  %s2376_s8 = smul.u32 56, %s2743_s21  ;;  %s1681_s21 = scalar_lea.sflag [#allocation3], %s3281_s14 }
  0x18   : > { %v343_v5 = vld [vmem:[%s3825_s1 + $0x178] sm:$0xff]  ;;  %1931 = vmatprep.subr.mxu1 %v359_v3  ;;  %1898 = vmatprep.subr.mxu0 %v326_v2  ;;  %v342_v9 = vld [vmem:[%s3825_s1 + $0x170] sm:$0xff]  ;;  %v324_v11 = vld [vmem:[%s3825_s1 + $0xe0] sm:$0xff] }
  0x19   : > { %1932 = vmatpush3.msra.mxu1 %v343_v5  ;;  %1899 = vmatpush3.msra.mxu0 %v310_v4  ;;  %v341_v12 = vld [vmem:[%s3825_s1 + $0x168] sm:$0xff]  ;;  %v308_v13 = vld [vmem:[%s3825_s1 + $0x60] sm:$0xff]  ;;  %v323_v15 = vld [vmem:[%s3825_s1 + $0xd8] sm:$0xff]  ;;  %s2797_s17 = scalar_lea.vmem %s3824_s0, %s2376_s8  ;;  %s2444_s8 = scalar_lea.vmem %s2443_s23, 256 }
  0x1a   : > { %1933 = vmatprep.subr.mxu1 %v358_v7  ;;  %1900 = vmatprep.subr.mxu0 %v325_v6  ;;  %v356_v14 = vld [vmem:[%s3825_s1 + $0x1e0] sm:$0xff]  ;;  %v307_v17 = vld [vmem:[%s3825_s1 + $0x58] sm:$0xff]  ;;  %v322_v19 = vld [vmem:[%s3825_s1 + $0xd0] sm:$0xff] }
  0x1b   : > { %1934 = vmatpush3.msra.mxu1 %v342_v9  ;;  %1901 = vmatpush3.msra.mxu0 %v309_v8  ;;  %v340_v16 = vld [vmem:[%s3825_s1 + $0x160] sm:$0xff]  ;;  %v355_v18 = vld [vmem:[%s3825_s1 + $0x1d8] sm:$0xff]  ;;  %v306_v21 = vld [vmem:[%s3825_s1 + $0x50] sm:$0xff] }
  0x1c   : > { %1935 = vmatprep.subr.mxu1 %v357_v10  ;;  %1902 = vmatprep.subr.mxu0 %v324_v11  ;;  %v339_v20 = vld [vmem:[%s3825_s1 + $0x158] sm:$0xff]  ;;  %v354_v22 = vld [vmem:[%s3825_s1 + $0x1d0] sm:$0xff]  ;;  %v321_v23 = vld [vmem:[%s3825_s1 + $0xc8] sm:$0xff] }
  0x1d   : > { %1936 = vmatpush3.msra.mxu1 %v341_v12  ;;  %1903 = vmatpush3.msra.mxu0 %v308_v13  ;;  %v338_v24 = vld [vmem:[%s3825_s1 + $0x150] sm:$0xff]  ;;  %v305_v25 = vld [vmem:[%s3825_s1 + $0x48] sm:$0xff]  ;;  %v320_v27 = vld [vmem:[%s3825_s1 + $0xc0] sm:$0xff] }
  0x1e   : > { %1937 = vmatprep.subr.mxu1 %v356_v14  ;;  %1904 = vmatprep.subr.mxu0 %v323_v15  ;;  %v353_v26 = vld [vmem:[%s3825_s1 + $0x1c8] sm:$0xff]  ;;  %v304_v29 = vld [vmem:[%s3825_s1 + $0x40] sm:$0xff]  ;;  %v319_v31 = vld [vmem:[%s3825_s1 + $0xb8] sm:$0xff]  ;;  %v2530_v14 = vmov 0.0  }
  0x1f   : > { %1938 = vmatpush3.msra.mxu1 %v340_v16  ;;  %1905 = vmatpush3.msra.mxu0 %v307_v17  ;;  %v337_v28 = vld [vmem:[%s3825_s1 + $0x148] sm:$0xff]  ;;  %v352_v30 = vld [vmem:[%s3825_s1 + $0x1c0] sm:$0xff]  ;;  %v303_v33 = vld [vmem:[%s3825_s1 + $0x38] sm:$0xff] }
  0x20   : > { %1939 = vmatprep.subr.mxu1 %v355_v18  ;;  %1906 = vmatprep.subr.mxu0 %v322_v19  ;;  %v336_v32 = vld [vmem:[%s3825_s1 + $0x140] sm:$0xff]  ;;  %v351_v34 = vld [vmem:[%s3825_s1 + $0x1b8] sm:$0xff]  ;;  %v318_v35 = vld [vmem:[%s3825_s1 + $0xb0] sm:$0xff] }
  0x21   : > { %1940 = vmatpush3.msra.mxu1 %v339_v20  ;;  %1907 = vmatpush3.msra.mxu0 %v306_v21  ;;  %v335_v36 = vld [vmem:[%s3825_s1 + $0x138] sm:$0xff]  ;;  %v302_v37 = vld [vmem:[%s3825_s1 + $0x30] sm:$0xff]  ;;  %v317_v39 = vld [vmem:[%s3825_s1 + $0xa8] sm:$0xff] }
  0x22   : > { %1941 = vmatprep.subr.mxu1 %v354_v22  ;;  %1908 = vmatprep.subr.mxu0 %v321_v23  ;;  %v350_v38 = vld [vmem:[%s3825_s1 + $0x1b0] sm:$0xff]  ;;  %v301_v41 = vld [vmem:[%s3825_s1 + $0x28] sm:$0xff]  ;;  %v316_v43 = vld [vmem:[%s3825_s1 + $0xa0] sm:$0xff] }
  0x23   : > { %1942 = vmatpush3.msra.mxu1 %v338_v24  ;;  %1909 = vmatpush3.msra.mxu0 %v305_v25  ;;  %v334_v40 = vld [vmem:[%s3825_s1 + $0x130] sm:$0xff]  ;;  %v349_v42 = vld [vmem:[%s3825_s1 + $0x1a8] sm:$0xff]  ;;  %v300_v45 = vld [vmem:[%s3825_s1 + $0x20] sm:$0xff] }
  0x24   : > { %1943 = vmatprep.subr.mxu1 %v353_v26  ;;  %1910 = vmatprep.subr.mxu0 %v320_v27  ;;  %v333_v44 = vld [vmem:[%s3825_s1 + $0x128] sm:$0xff]  ;;  %v348_v46 = vld [vmem:[%s3825_s1 + $0x1a0] sm:$0xff]  ;;  %v315_v47 = vld [vmem:[%s3825_s1 + $0x98] sm:$0xff] }
  0x25   : > { %1944 = vmatpush3.msra.mxu1 %v337_v28  ;;  %1911 = vmatpush3.msra.mxu0 %v304_v29  ;;  %v332_v48 = vld [vmem:[%s3825_s1 + $0x120] sm:$0xff]  ;;  %v299_v49 = vld [vmem:[%s3825_s1 + $0x18] sm:$0xff]  ;;  %v314_v51 = vld [vmem:[%s3825_s1 + $0x90] sm:$0xff] }
  0x26   : > { %1945 = vmatprep.subr.mxu1 %v352_v30  ;;  %1912 = vmatprep.subr.mxu0 %v319_v31  ;;  %v347_v50 = vld [vmem:[%s3825_s1 + $0x198] sm:$0xff]  ;;  %v298_v53 = vld [vmem:[%s3825_s1 + $0x10] sm:$0xff]  ;;  %v313_v55 = vld [vmem:[%s3825_s1 + $0x88] sm:$0xff] }
  0x27   : > { %1946 = vmatpush3.msra.mxu1 %v336_v32  ;;  %1913 = vmatpush3.msra.mxu0 %v303_v33  ;;  %v331_v52 = vld [vmem:[%s3825_s1 + $0x118] sm:$0xff]  ;;  %v346_v54 = vld [vmem:[%s3825_s1 + $0x190] sm:$0xff]  ;;  %v297_v57 = vld [vmem:[%s3825_s1 + $0x8] sm:$0xff] }
  0x28   : > { %1947 = vmatprep.subr.mxu1 %v351_v34  ;;  %1914 = vmatprep.subr.mxu0 %v318_v35  ;;  %v330_v56 = vld [vmem:[%s3825_s1 + $0x110] sm:$0xff]  ;;  %v345_v58 = vld [vmem:[%s3825_s1 + $0x188] sm:$0xff]  ;;  %v312_v59 = vld [vmem:[%s3825_s1 + $0x80] sm:$0xff] }
  0x29   : > { %1948 = vmatpush3.msra.mxu1 %v335_v36  ;;  %1915 = vmatpush3.msra.mxu0 %v302_v37  ;;  %v290_v60 = vld [vmem:[%s2797_s17 + $0x8] sm:$0xff]  ;;  %v296_v61 = vld [vmem:[%s3825_s1] sm:$0xff]  ;;  %v391_v1 = vld [vmem:[%s3825_s1 + $0x2f8] sm:$0xff] }
  0x2a   : > { %1949 = vmatprep.subr.mxu1 %v350_v38  ;;  %1916 = vmatprep.subr.mxu0 %v317_v39  ;;  %v329_v62 = vld [vmem:[%s3825_s1 + $0x108] sm:$0xff]  ;;  %v289_v63 = vld [vmem:[%s2797_s17] sm:$0xff]  ;;  %v292_v3 = vld [vmem:[%s2797_s17 + $0x18] sm:$0xff] }
  0x2b   : > { %1950 = vmatpush3.msra.mxu1 %v334_v40  ;;  %1917 = vmatpush3.msra.mxu0 %v301_v41  ;;  %v344_v0 = vld [vmem:[%s3825_s1 + $0x180] sm:$0xff]  ;;  %v375_v4 = vld [vmem:[%s3825_s1 + $0x278] sm:$0xff]  ;;  %v291_v5 = vld [vmem:[%s2797_s17 + $0x10] sm:$0xff] }
  0x2c   : > { %1951 = vmatprep.subr.mxu1 %v349_v42  ;;  %1918 = vmatprep.subr.mxu0 %v316_v43  ;;  %v328_v2 = vld [vmem:[%s3825_s1 + $0x100] sm:$0xff]  ;;  %v390_v6 = vld [vmem:[%s3825_s1 + $0x2f0] sm:$0xff]  ;;  %v294_v8 = vld [vmem:[%s2797_s17 + $0x28] sm:$0xff] }
  0x2d   : > { %1952 = vmatpush3.msra.mxu1 %v333_v44  ;;  %1919 = vmatpush3.msra.mxu0 %v300_v45  ;;  %v374_v7 = vld [vmem:[%s3825_s1 + $0x270] sm:$0xff]  ;;  %v389_v9 = vld [vmem:[%s3825_s1 + $0x2e8] sm:$0xff]  ;;  %v388_v12 = vld [vmem:[%s3825_s1 + $0x2e0] sm:$0xff] }
  0x2e   : > { %1953 = vmatprep.subr.mxu1 %v348_v46  ;;  %1920 = vmatprep.subr.mxu0 %v315_v47  ;;  %v373_v10 = vld [vmem:[%s3825_s1 + $0x268] sm:$0xff]  ;;  %v372_v13 = vld [vmem:[%s3825_s1 + $0x260] sm:$0xff]  ;;  %v387_v16 = vld [vmem:[%s3825_s1 + $0x2d8] sm:$0xff] }
  0x2f   : > { %1954 = vmatpush3.msra.mxu1 %v332_v48  ;;  %1921 = vmatpush3.msra.mxu0 %v299_v49  ;;  %v393_v11 = vld [vmem:[%s3825_s1 + $0x308] sm:$0xff]  ;;  %v392_v15 = vld [vmem:[%s3825_s1 + $0x300] sm:$0xff]  ;;  %v371_v17 = vld [vmem:[%s3825_s1 + $0x258] sm:$0xff] }
  0x30   : > { %1955 = vmatprep.subr.mxu1 %v347_v50  ;;  %1922 = vmatprep.subr.mxu0 %v314_v51  ;;  %v295_v18 = vld [vmem:[%s2797_s17 + $0x30] sm:$0xff]  ;;  %v385_v21 = vld [vmem:[%s3825_s1 + $0x2c8] sm:$0xff]  ;;  %v384_v23 = vld [vmem:[%s3825_s1 + $0x2c0] sm:$0xff] }
  0x31   : > { %1956 = vmatpush3.msra.mxu1 %v331_v52  ;;  %1923 = vmatpush3.msra.mxu0 %v298_v53  ;;  %v386_v19 = vld [vmem:[%s3825_s1 + $0x2d0] sm:$0xff]  ;;  %v369_v22 = vld [vmem:[%s3825_s1 + $0x248] sm:$0xff]  ;;  %v368_v24 = vld [vmem:[%s3825_s1 + $0x240] sm:$0xff] }
  0x32   : > { %1957 = vmatprep.subr.mxu1 %v346_v54  ;;  %1924 = vmatprep.subr.mxu0 %v313_v55  ;;  %v370_v20 = vld [vmem:[%s3825_s1 + $0x250] sm:$0xff]  ;;  %v383_v25 = vld [vmem:[%s3825_s1 + $0x2b8] sm:$0xff]  ;;  %v381_v29 = vld [vmem:[%s3825_s1 + $0x2a8] sm:$0xff] }
  0x33   : > { %1958 = vmatpush3.msra.mxu1 %v330_v56  ;;  %1925 = vmatpush3.msra.mxu0 %v297_v57  ;;  %v367_v26 = vld [vmem:[%s3825_s1 + $0x238] sm:$0xff]  ;;  %v382_v27 = vld [vmem:[%s3825_s1 + $0x2b0] sm:$0xff]  ;;  %v365_v30 = vld [vmem:[%s3825_s1 + $0x228] sm:$0xff] }
  0x34   : > { %1959 = vmatprep.subr.mxu1 %v345_v58  ;;  %1926 = vmatprep.subr.mxu0 %v312_v59  ;;  %v366_v28 = vld [vmem:[%s3825_s1 + $0x230] sm:$0xff]  ;;  %v380_v31 = vld [vmem:[%s3825_s1 + $0x2a0] sm:$0xff]  ;;  %v379_v33 = vld [vmem:[%s3825_s1 + $0x298] sm:$0xff] }
  0x35   : > { %466 = vmatprep.mubr.f32.mxu0 %v290_v60  ;;  %1927 = vmatpush3.msra.mxu0 %v296_v61  ;;  %v364_v32 = vld [vmem:[%s3825_s1 + $0x220] sm:$0xff]  ;;  %v363_v34 = vld [vmem:[%s3825_s1 + $0x218] sm:$0xff]  ;;  %v378_v35 = vld [vmem:[%s3825_s1 + $0x290] sm:$0xff] }
  0x36   : > { %1960 = vmatpush3.msra.mxu1 %v329_v62  ;;  %467 = vmatmul.mubr.f32.vlgmr.msra.gmra.mxu0 %v289_v63  ;;  %v362_v36 = vld [vmem:[%s3825_s1 + $0x210] sm:$0xff]  ;;  %v377_v37 = vld [vmem:[%s3825_s1 + $0x288] sm:$0xff]  ;;  %v376_v39 = vld [vmem:[%s3825_s1 + $0x280] sm:$0xff] }
  0x37   : > { %1961 = vmatprep.subr.mxu1 %v344_v0  ;;  %1966 = vmatprep.subr.mxu0 %v391_v1  ;;  %v361_v38 = vld [vmem:[%s3825_s1 + $0x208] sm:$0xff]  ;;  %v360_v40 = vld [vmem:[%s3825_s1 + $0x200] sm:$0xff]  ;;  %v698_v42 = vld [vmem:[%s3826_s2 + $0x78] sm:$0xff] }
  0x38   : > { %1962 = vmatpush3.msra.mxu1 %v328_v2  ;;  %536 = vmatprep.mubr.f32.mxu1 %v292_v3  ;;  %v293_v41 = vld [vmem:[%s2797_s17 + $0x20] sm:$0xff]  ;;  %v697_v43 = vld [vmem:[%s3826_s2 + $0x70] sm:$0xff]  ;;  %v696_v44 = vld [vmem:[%s3826_s2 + $0x68] sm:$0xff]  ;;  %s3287_s17 = scalar_lea.vmem [#allocation2], %s1808_s15 }
  0x39   : > { %1967 = vmatpush3.msra.mxu0 %v375_v4  ;;  %537 = vmatmul.mubr.f32.vlgmr.msra.gmra.mxu1 %v291_v5  ;;  %v695_v45 = vld [vmem:[%s3826_s2 + $0x60] sm:$0xff]  ;;  %v694_v46 = vld [vmem:[%s3826_s2 + $0x58] sm:$0xff]  ;;  %v693_v47 = vld [vmem:[%s3826_s2 + $0x50] sm:$0xff]  ;;  %s1699_s19 = sshll.u32 %s3287_s17, 4  ;;  %s1700_s19 = int_to_ptr.vmem [resolvable:$true] %s1699_s19 }
  0x3a   : > { %1968 = vmatprep.subr.mxu0 %v390_v6  ;;  %606 = vmatprep.mubr.f32.mxu0 %v294_v8  ;;  %v692_v48 = vld [vmem:[%s3826_s2 + $0x48] sm:$0xff]  ;;  %v691_v49 = vld [vmem:[%s3826_s2 + $0x40] sm:$0xff]  ;;  %v690_v50 = vld [vmem:[%s3826_s2 + $0x38] sm:$0xff]  ;;  %s2438_s20 = scalar_lea.vmem %s1700_s19, 128  ;;  %p2445_p0 = scmp.lt.s32.totalorder %s1700_s19, %s2443_s23 }
  0x3b   : > { %1969 = vmatpush3.msra.mxu0 %v374_v7  ;;  %2123 = vmatprep.subr.mxu1 %v2530_v14  ;;  %v689_v51 = vld [vmem:[%s3826_s2 + $0x30] sm:$0xff]  ;;  %v688_v52 = vld [vmem:[%s3826_s2 + $0x28] sm:$0xff]  ;;  %v687_v53 = vld [vmem:[%s3826_s2 + $0x20] sm:$0xff]  ;;  %p2439_p11 = scmp.ne.s32.totalorder %s1700_s19, %s2438_s20  ;;  %p2446_p1 = scmp.lt.s32.totalorder %s2444_s8, %s2438_s20 }
  0x3c   : > { %1970 = vmatprep.subr.mxu0 %v389_v9  ;;  %2124 = vmatpush3.msra.mxu1 %v393_v11  ;;  %v686_v54 = vld [vmem:[%s3826_s2 + $0x18] sm:$0xff]  ;;  %v685_v55 = vld [vmem:[%s3826_s2 + $0x10] sm:$0xff]  ;;  %v684_v56 = vld [vmem:[%s3826_s2 + $0x8] sm:$0xff]  ;;  %v394_v11 = vlaneseq }
  0x3d   : > { %1971 = vmatpush3.msra.mxu0 %v373_v10  ;;  %2125 = vmatprep.subr.mxu1 %v2530_v14  ;;  %v683_v57 = vld [vmem:[%s3826_s2] sm:$0xff]  ;;  %v1826_v58 = vld [vmem:[%s3826_s2 + $0xf8] sm:$0xff]  ;;  %v1825_v59 = vld [vmem:[%s3826_s2 + $0xf0] sm:$0xff]  ;;  %p2440_p12 = pnand %p2439_p11, %p2612_p5  ;;  %p2447_p2 = por %p2446_p1, %p2445_p0 }
  0x3e   : > { %1972 = vmatprep.subr.mxu0 %v388_v12  ;;  %2126 = vmatpush3.msra.mxu1 %v392_v15  ;;  %v1824_v60 = vld [vmem:[%s3826_s2 + $0xe8] sm:$0xff]  ;;  %v1823_v61 = vld [vmem:[%s3826_s2 + $0xe0] sm:$0xff]  ;;  %v1822_v62 = vld [vmem:[%s3826_s2 + $0xd8] sm:$0xff]  ;;  %v3062_v12 = vshrl.u32 %v394_v11, 7 }
  0x3f   : > { %1973 = vmatpush3.msra.mxu0 %v372_v13  ;;  %2127 = vmatprep.mubr.msk.f32.mxu1 %vm2531_vm1, %v2530_v14  ;;  %v1821_v63 = vld [vmem:[%s3826_s2 + $0xd0] sm:$0xff]  ;;  %v1820_v0 = vld [vmem:[%s3826_s2 + $0xc8] sm:$0xff]  ;;  %v1819_v1 = vld [vmem:[%s3826_s2 + $0xc0] sm:$0xff]  ;;  %p2441_p13 = pneg %p2440_p12 }
  0x40   : > { %1974 = vmatprep.subr.mxu0 %v387_v16  ;;  %2128 = vmatmul.mubr.msk.f32.vlgmr.msra.gmra.mxu1 %vm398_vm0, %v295_v18  ;;  %v1818_v2 = vld [vmem:[%s3826_s2 + $0xb8] sm:$0xff]  ;;  %v1817_v3 = vld [vmem:[%s3826_s2 + $0xb0] sm:$0xff]  ;;  %v1816_v4 = vld [vmem:[%s3826_s2 + $0xa8] sm:$0xff]  ;;  %v396_v15 = vsub.s32 0, %v3062_v12 }
  0x41   : > { %1975 = vmatpush3.msra.mxu0 %v371_v17  ;;  %2130 = vmatprep.subr.mxu1 %v2530_v14  ;;  %v1815_v5 = vld [vmem:[%s3826_s2 + $0xa0] sm:$0xff]  ;;  %v1814_v6 = vld [vmem:[%s3826_s2 + $0x98] sm:$0xff]  ;;  %p2448_p3 = pnand %p2447_p2, %p2441_p13 }
  0x42   : > { %1976 = vmatprep.subr.mxu0 %v386_v19  ;;  %2162 = vmatprep.mubr.msk.f32.mxu1 %vm2531_vm1, %v2530_v14  ;;  %v3068_v16 = vld [vmem:[%s3828_s4] sm:$0xff] }
  0x43   : > { %1977 = vmatpush3.msra.mxu0 %v370_v20  ;;  %2131 = vmatpush3.msra.mxu1 %v698_v42  ;;  %v397_v18 = vrot.slane %v3068_v16, %v396_v15  ;;  %v1832_v42 = vld [vmem:[%s3826_s2 + $0x128] sm:$0xff]  ;;  %v1843_v11 = vld [vmem:[%s3826_s2 + $0x180] sm:$0xff] }
  0x44   : > { %1978 = vmatprep.subr.mxu0 %v385_v21  ;;  %2132 = vmatprep.subr.mxu1 %v2530_v14 }
  0x45   : > { %1979 = vmatpush3.msra.mxu0 %v369_v22  ;;  %2133 = vmatpush3.msra.mxu1 %v697_v43  ;;  %v1831_v43 = vld [vmem:[%s3826_s2 + $0x120] sm:$0xff] }
  0x46   : > { %1980 = vmatprep.subr.mxu0 %v384_v23  ;;  %2134 = vmatprep.subr.mxu1 %v2530_v14 }
  0x47   : > { %1981 = vmatpush3.msra.mxu0 %v368_v24  ;;  %2135 = vmatpush3.msra.mxu1 %v696_v44  ;;  %v1830_v44 = vld [vmem:[%s3826_s2 + $0x118] sm:$0xff] }
  0x48   : > { %1982 = vmatprep.subr.mxu0 %v383_v25  ;;  %2136 = vmatprep.subr.mxu1 %v2530_v14 }
  0x49   : > { %1983 = vmatpush3.msra.mxu0 %v367_v26  ;;  %2137 = vmatpush3.msra.mxu1 %v695_v45  ;;  %v701_v45 = vsub.s32 1, %v3062_v12 }
  0x4a   : > { %1984 = vmatprep.subr.mxu0 %v382_v27  ;;  %2138 = vmatprep.subr.mxu1 %v2530_v14 }
  0x4b   : > { %1985 = vmatpush3.msra.mxu0 %v366_v28  ;;  %2139 = vmatpush3.msra.mxu1 %v694_v46  ;;  %v702_v46 = vrot.slane %v3068_v16, %v701_v45 }
  0x4c   : > { %1986 = vmatprep.subr.mxu0 %v381_v29  ;;  %2140 = vmatprep.subr.mxu1 %v2530_v14  ;;  %v1813_v29 = vld [vmem:[%s3826_s2 + $0x90] sm:$0xff] }
  0x4d   : > { %1987 = vmatpush3.msra.mxu0 %v365_v30  ;;  %2141 = vmatpush3.msra.mxu1 %v693_v47  ;;  %v1812_v30 = vld [vmem:[%s3826_s2 + $0x88] sm:$0xff] }
  0x4e   : > { %1988 = vmatprep.subr.mxu0 %v380_v31  ;;  %2142 = vmatprep.subr.mxu1 %v2530_v14  ;;  %v1811_v31 = vld [vmem:[%s3826_s2 + $0x80] sm:$0xff] }
  0x4f   : > { %1989 = vmatpush3.msra.mxu0 %v364_v32  ;;  %2143 = vmatpush3.msra.mxu1 %v692_v48  ;;  %v1842_v32 = vld [vmem:[%s3826_s2 + $0x178] sm:$0xff] }
  0x50   : > { %1990 = vmatprep.subr.mxu0 %v379_v33  ;;  %2144 = vmatprep.subr.mxu1 %v2530_v14  ;;  %v1841_v33 = vld [vmem:[%s3826_s2 + $0x170] sm:$0xff] }
  0x51   : > { %1991 = vmatpush3.msra.mxu0 %v363_v34  ;;  %2145 = vmatpush3.msra.mxu1 %v691_v49  ;;  %v1840_v34 = vld [vmem:[%s3826_s2 + $0x168] sm:$0xff] }
  0x52   : > { %1992 = vmatprep.subr.mxu0 %v378_v35  ;;  %2146 = vmatprep.subr.mxu1 %v2530_v14  ;;  %v1839_v35 = vld [vmem:[%s3826_s2 + $0x160] sm:$0xff] }
  0x53   : > { %1993 = vmatpush3.msra.mxu0 %v362_v36  ;;  %2147 = vmatpush3.msra.mxu1 %v690_v50  ;;  %v1838_v36 = vld [vmem:[%s3826_s2 + $0x158] sm:$0xff] }
  0x54   : > { %1994 = vmatprep.subr.mxu0 %v377_v37  ;;  %2148 = vmatprep.subr.mxu1 %v2530_v14  ;;  %v1837_v37 = vld [vmem:[%s3826_s2 + $0x150] sm:$0xff] }
  0x55   : > { %1995 = vmatpush3.msra.mxu0 %v361_v38  ;;  %2149 = vmatpush3.msra.mxu1 %v689_v51  ;;  %v1836_v38 = vld [vmem:[%s3826_s2 + $0x148] sm:$0xff]  ;;  %v1829_v51 = vld [vmem:[%s3826_s2 + $0x110] sm:$0xff] }
  0x56   : > { %1996 = vmatprep.subr.mxu0 %v376_v39  ;;  %2150 = vmatprep.subr.mxu1 %v2530_v14  ;;  %v1835_v39 = vld [vmem:[%s3826_s2 + $0x140] sm:$0xff] }
  0x57   : > { %1997 = vmatpush3.msra.mxu0 %v360_v40  ;;  %2151 = vmatpush3.msra.mxu1 %v688_v52  ;;  %v1834_v40 = vld [vmem:[%s3826_s2 + $0x138] sm:$0xff]  ;;  %v1828_v52 = vld [vmem:[%s3826_s2 + $0x108] sm:$0xff] }
  0x58   : > { %607 = vmatmul.mubr.f32.vlgmr.msra.gmra.mxu0 %v293_v41  ;;  %2165 = vmatprep.subr.mxu0 %v2530_v14  ;;  %v1833_v41 = vld [vmem:[%s3826_s2 + $0x130] sm:$0xff] }
  0x59   : > { %2197 = vmatprep.mubr.msk.f32.mxu0 %vm2531_vm1, %v2530_v14  ;;  %2152 = vmatprep.subr.mxu1 %v2530_v14 }
  0x5a   : > { %2153 = vmatpush3.msra.mxu1 %v687_v53  ;;  %2166 = vmatpush3.msra.mxu0 %v1826_v58  ;;  %v1827_v53 = vld [vmem:[%s3826_s2 + $0x100] sm:$0xff]  ;;  %v1854_v58 = vld [vmem:[%s3826_s2 + $0x1d8] sm:$0xff] }
  0x5b   : > { %2154 = vmatprep.subr.mxu1 %v2530_v14  ;;  %2167 = vmatprep.subr.mxu0 %v2530_v14 }
  0x5c   : > { %2155 = vmatpush3.msra.mxu1 %v686_v54  ;;  %2168 = vmatpush3.msra.mxu0 %v1825_v59  ;;  %v1858_v54 = vld [vmem:[%s3826_s2 + $0x1f8] sm:$0xff]  ;;  %v1853_v59 = vld [vmem:[%s3826_s2 + $0x1d0] sm:$0xff] }
  0x5d   : > { %2156 = vmatprep.subr.mxu1 %v2530_v14  ;;  %2169 = vmatprep.subr.mxu0 %v2530_v14 }
  0x5e   : > { %2157 = vmatpush3.msra.mxu1 %v685_v55  ;;  %2170 = vmatpush3.msra.mxu0 %v1824_v60  ;;  %v1857_v55 = vld [vmem:[%s3826_s2 + $0x1f0] sm:$0xff]  ;;  %v1852_v60 = vld [vmem:[%s3826_s2 + $0x1c8] sm:$0xff] }
  0x5f   : > { %2158 = vmatprep.subr.mxu1 %v2530_v14  ;;  %2171 = vmatprep.subr.mxu0 %v2530_v14 }
  0x60   : > { %2159 = vmatpush3.msra.mxu1 %v684_v56  ;;  %2172 = vmatpush3.msra.mxu0 %v1823_v61  ;;  %v1856_v56 = vld [vmem:[%s3826_s2 + $0x1e8] sm:$0xff]  ;;  %v1851_v61 = vld [vmem:[%s3826_s2 + $0x1c0] sm:$0xff] }
  0x61   : > { %2160 = vmatprep.subr.mxu1 %v2530_v14  ;;  %2173 = vmatprep.subr.mxu0 %v2530_v14 }
  0x62   : > { %2161 = vmatpush3.msra.mxu1 %v683_v57  ;;  %2174 = vmatpush3.msra.mxu0 %v1822_v62  ;;  %v1855_v57 = vld [vmem:[%s3826_s2 + $0x1e0] sm:$0xff]  ;;  %v1850_v62 = vld [vmem:[%s3826_s2 + $0x1b8] sm:$0xff] }
  0x63   : > { %2200 = vmatprep.subr.mxu1 %v2530_v14  ;;  %2175 = vmatprep.subr.mxu0 %v2530_v14 }
  0x64   : > { %2176 = vmatpush3.msra.mxu0 %v1821_v63  ;;  %v1849_v63 = vld [vmem:[%s3826_s2 + $0x1b0] sm:$0xff] }
  0x65   : > { %2177 = vmatprep.subr.mxu0 %v2530_v14 }
  0x66   : > { %2178 = vmatpush3.msra.mxu0 %v1820_v0  ;;  %v1848_v0 = vld [vmem:[%s3826_s2 + $0x1a8] sm:$0xff] }
  0x67   : > { %2179 = vmatprep.subr.mxu0 %v2530_v14 }
  0x68   : > { %2180 = vmatpush3.msra.mxu0 %v1819_v1  ;;  %v1847_v1 = vld [vmem:[%s3826_s2 + $0x1a0] sm:$0xff] }
  0x69   : > { %2181 = vmatprep.subr.mxu0 %v2530_v14 }
  0x6a   : > { %2182 = vmatpush3.msra.mxu0 %v1818_v2  ;;  %v1846_v2 = vld [vmem:[%s3826_s2 + $0x198] sm:$0xff] }
  0x6b   : > { %2183 = vmatprep.subr.mxu0 %v2530_v14 }
  0x6c   : > { %2184 = vmatpush3.msra.mxu0 %v1817_v3  ;;  %v1845_v3 = vld [vmem:[%s3826_s2 + $0x190] sm:$0xff] }
  0x6d   : > { %2185 = vmatprep.subr.mxu0 %v2530_v14 }
  0x6e   : > { %2186 = vmatpush3.msra.mxu0 %v1816_v4  ;;  %v793_v4 = vsub.s32 2, %v3062_v12 }
  0x6f   : > { %2187 = vmatprep.subr.mxu0 %v2530_v14 }
  0x70   : > { %2188 = vmatpush3.msra.mxu0 %v1815_v5  ;;  %v794_v5 = vrot.slane %v3068_v16, %v793_v4 }
  0x71   : > { %2189 = vmatprep.subr.mxu0 %v2530_v14 }
  0x72   : > { %2190 = vmatpush3.msra.mxu0 %v1814_v6 }
  0x73   : > { %2191 = vmatprep.subr.mxu0 %v2530_v14 }
  0x74   : > { %2192 = vmatpush3.msra.mxu0 %v1813_v29  ;;  %v885_v29 = vsub.s32 3, %v3062_v12 }
  0x75   : > { %2193 = vmatprep.subr.mxu0 %v2530_v14 }
  0x76   : > { %2194 = vmatpush3.msra.mxu0 %v1812_v30  ;;  %v886_v30 = vrot.slane %v3068_v16, %v885_v29 }
  0x77   : > { %2195 = vmatprep.subr.mxu0 %v2530_v14 }
  0x78   : > { %2196 = vmatpush3.msra.mxu0 %v1811_v31 }
  0x79   : > { %2235 = vmatprep.subr.mxu0 %v2530_v14 }
  0xf6   : > { %v1928_v13 = vpop.f32.mrf.mxu0 }
  0xf8   : > { %v1929_v17 = vpop.f32.mrf.mxu0 }
  0xf9   : > { %v1963_v7 = vpop.f32.mrf.mxu1  ;;  %v1930_v19 = vadd.f32 %v1929_v17, %v1928_v13  ;;  %v1874_v13 = vld [vmem:[%s3826_s2 + $0x278] sm:$0xff]  ;;  %v1873_v17 = vld [vmem:[%s3826_s2 + $0x270] sm:$0xff] }
  0xfb   : > { %v1964_v8 = vpop.f32.mrf.mxu1  ;;  %v469_v20 = vadd.f32 %v1930_v19, %v397_v18  ;;  %v1872_v18 = vld [vmem:[%s3826_s2 + $0x268] sm:$0xff]  ;;  %v1871_v19 = vld [vmem:[%s3826_s2 + $0x260] sm:$0xff] }
  0xfc   : > { %v1965_v21 = vadd.f32 %v1964_v8, %v1963_v7 }
  0xfe   : > { %v539_v24 = vadd.f32 %v1965_v21, %v469_v20  ;;  %v1870_v20 = vld [vmem:[%s3826_s2 + $0x258] sm:$0xff]  ;;  %v1869_v21 = vld [vmem:[%s3826_s2 + $0x250] sm:$0xff] }
 0x100   : > { %v678_v9 = vpop.f32.mrf.mxu1 }
 0x102   : > { %v2129_v10 = vpop.f32.mrf.mxu1 }
 0x103   : > { %v1844_v10 = vld [vmem:[%s3826_s2 + $0x188] sm:$0xff] }
 0x118   : > { %v1998_v22 = vpop.f32.mrf.mxu0 }
 0x11a   : > { %v1999_v23 = vpop.f32.mrf.mxu0 }
 0x11b   : > { %v2000_v25 = vadd.f32 %v1999_v23, %v1998_v22  ;;  %v1868_v22 = vld [vmem:[%s3826_s2 + $0x248] sm:$0xff]  ;;  %v1867_v23 = vld [vmem:[%s3826_s2 + $0x240] sm:$0xff] }
 0x11d   : > { %v609_v26 = vadd.f32 %v2000_v25, %v539_v24  ;;  %v1866_v24 = vld [vmem:[%s3826_s2 + $0x238] sm:$0xff]  ;;  %v1865_v25 = vld [vmem:[%s3826_s2 + $0x230] sm:$0xff] }
 0x11f   : > { %v679_v27 = vadd.f32 %v678_v9, %v609_v26  ;;  %v1864_v26 = vld [vmem:[%s3826_s2 + $0x228] sm:$0xff] }
 0x121   : > { %v682_v28 = vmax.f32 %v679_v27, 0.0  ;;  %v1863_v27 = vld [vmem:[%s3826_s2 + $0x220] sm:$0xff] }
 0x123   : > { %2163 = vmatmul.mubr.f32.vlgmr.msra.gmra.mxu1 %v682_v28  ;;  %v1862_v28 = vld [vmem:[%s3826_s2 + $0x218] sm:$0xff] }
 0x124   : > { %2232 = vmatprep.mubr.msk.f32.mxu1 %vm2531_vm1, %v2530_v14  ;;  %2201 = vmatpush3.msra.mxu1 %v1842_v32 }
 0x125   : > { %2202 = vmatprep.subr.mxu1 %v2530_v14 }
 0x126   : > { %2203 = vmatpush3.msra.mxu1 %v1841_v33 }
 0x127   : > { %2204 = vmatprep.subr.mxu1 %v2530_v14 }
 0x128   : > { %2205 = vmatpush3.msra.mxu1 %v1840_v34  ;;  %v1861_v34 = vld [vmem:[%s3826_s2 + $0x210] sm:$0xff] }
 0x129   : > { %2206 = vmatprep.subr.mxu1 %v2530_v14 }
 0x12a   : > { %2207 = vmatpush3.msra.mxu1 %v1839_v35  ;;  %v1860_v35 = vld [vmem:[%s3826_s2 + $0x208] sm:$0xff] }
 0x12b   : > { %2208 = vmatprep.subr.mxu1 %v2530_v14 }
 0x12c   : > { %2209 = vmatpush3.msra.mxu1 %v1838_v36  ;;  %v1859_v36 = vld [vmem:[%s3826_s2 + $0x200] sm:$0xff] }
 0x12d   : > { %2210 = vmatprep.subr.mxu1 %v2530_v14 }
 0x12e   : > { %2211 = vmatpush3.msra.mxu1 %v1837_v37  ;;  %v1890_v37 = vld [vmem:[%s3826_s2 + $0x2f8] sm:$0xff] }
 0x12f   : > { %2212 = vmatprep.subr.mxu1 %v2530_v14 }
 0x130   : > { %2213 = vmatpush3.msra.mxu1 %v1836_v38  ;;  %v1889_v38 = vld [vmem:[%s3826_s2 + $0x2f0] sm:$0xff] }
 0x131   : > { %2214 = vmatprep.subr.mxu1 %v2530_v14 }
 0x132   : > { %2215 = vmatpush3.msra.mxu1 %v1835_v39  ;;  %v1888_v39 = vld [vmem:[%s3826_s2 + $0x2e8] sm:$0xff] }
 0x133   : > { %2216 = vmatprep.subr.mxu1 %v2530_v14 }
 0x134   : > { %2217 = vmatpush3.msra.mxu1 %v1834_v40  ;;  %v1887_v40 = vld [vmem:[%s3826_s2 + $0x2e0] sm:$0xff] }
 0x135   : > { %2218 = vmatprep.subr.mxu1 %v2530_v14 }
 0x136   : > { %2219 = vmatpush3.msra.mxu1 %v1833_v41  ;;  %v1886_v41 = vld [vmem:[%s3826_s2 + $0x2d8] sm:$0xff] }
 0x137   : > { %2220 = vmatprep.subr.mxu1 %v2530_v14 }
 0x138   : > { %2221 = vmatpush3.msra.mxu1 %v1832_v42  ;;  %v1885_v42 = vld [vmem:[%s3826_s2 + $0x2d0] sm:$0xff] }
 0x139   : > { %2222 = vmatprep.subr.mxu1 %v2530_v14 }
 0x13a   : > { %2223 = vmatpush3.msra.mxu1 %v1831_v43  ;;  %v1884_v43 = vld [vmem:[%s3826_s2 + $0x2c8] sm:$0xff] }
 0x13b   : > { %2224 = vmatprep.subr.mxu1 %v2530_v14 }
 0x13c   : > { %2225 = vmatpush3.msra.mxu1 %v1830_v44  ;;  %v1883_v44 = vld [vmem:[%s3826_s2 + $0x2c0] sm:$0xff] }
 0x13d   : > { %2226 = vmatprep.subr.mxu1 %v2530_v14 }
 0x13e   : > { %2227 = vmatpush3.msra.mxu1 %v1829_v51  ;;  %v977_v51 = vsub.s32 4, %v3062_v12 }
 0x13f   : > { %2228 = vmatprep.subr.mxu1 %v2530_v14 }
 0x140   : > { %2229 = vmatpush3.msra.mxu1 %v1828_v52  ;;  %v978_v52 = vrot.slane %v3068_v16, %v977_v51 }
 0x141   : > { %2230 = vmatprep.subr.mxu1 %v2530_v14 }
 0x142   : > { %2231 = vmatpush3.msra.mxu1 %v1827_v53 }
 0x143   : > { %2270 = vmatprep.subr.mxu1 %v2530_v14 }
 0x1e3   : > { %v769_v47 = vpop.f32.mrf.mxu1 }
 0x1e4   : > { %v770_v48 = vadd.f32 %v769_v47, %v702_v46  ;;  %v1882_v46 = vld [vmem:[%s3826_s2 + $0x2b8] sm:$0xff]  ;;  %v1881_v47 = vld [vmem:[%s3826_s2 + $0x2b0] sm:$0xff] }
 0x1e5   : > { %v2164_v49 = vpop.f32.mrf.mxu1 }
 0x1e6   : > { %v773_v50 = vmax.f32 %v770_v48, 0.0  ;;  %v1880_v48 = vld [vmem:[%s3826_s2 + $0x2a8] sm:$0xff]  ;;  %v1879_v49 = vld [vmem:[%s3826_s2 + $0x2a0] sm:$0xff] }
 0x1e8   : > { %2198 = vmatmul.mubr.f32.vlgmr.msra.gmra.mxu0 %v773_v50  ;;  %v1878_v50 = vld [vmem:[%s3826_s2 + $0x298] sm:$0xff] }
 0x1e9   : > { %2267 = vmatprep.mubr.msk.f32.mxu0 %vm2531_vm1, %v2530_v14  ;;  %2236 = vmatpush3.msra.mxu0 %v1858_v54 }
 0x1ea   : > { %2237 = vmatprep.subr.mxu0 %v2530_v14 }
 0x1eb   : > { %2238 = vmatpush3.msra.mxu0 %v1857_v55 }
 0x1ec   : > { %2239 = vmatprep.subr.mxu0 %v2530_v14 }
 0x1ed   : > { %2240 = vmatpush3.msra.mxu0 %v1856_v56 }
 0x1ee   : > { %2241 = vmatprep.subr.mxu0 %v2530_v14 }
 0x1ef   : > { %2242 = vmatpush3.msra.mxu0 %v1855_v57  ;;  %v1877_v57 = vld [vmem:[%s3826_s2 + $0x290] sm:$0xff] }
 0x1f0   : > { %2243 = vmatprep.subr.mxu0 %v2530_v14 }
 0x1f1   : > { %2244 = vmatpush3.msra.mxu0 %v1854_v58  ;;  %v1876_v58 = vld [vmem:[%s3826_s2 + $0x288] sm:$0xff] }
 0x1f2   : > { %2245 = vmatprep.subr.mxu0 %v2530_v14 }
 0x1f3   : > { %2246 = vmatpush3.msra.mxu0 %v1853_v59  ;;  %v1875_v59 = vld [vmem:[%s3826_s2 + $0x280] sm:$0xff] }
 0x1f4   : > { %2247 = vmatprep.subr.mxu0 %v2530_v14 }
 0x1f5   : > { %2248 = vmatpush3.msra.mxu0 %v1852_v60  ;;  %v1340_v60 = vld [vmem:[%s3827_s3 + $0x350] sm:$0xff] }
 0x1f6   : > { %2249 = vmatprep.subr.mxu0 %v2530_v14 }
 0x1f7   : > { %2250 = vmatpush3.msra.mxu0 %v1851_v61  ;;  %v1342_v61 = vld [vmem:[%s3827_s3 + $0x360] sm:$0xff] }
 0x1f8   : > { %2251 = vmatprep.subr.mxu0 %v2530_v14 }
 0x1f9   : > { %2252 = vmatpush3.msra.mxu0 %v1850_v62  ;;  %v1339_v62 = vld [vmem:[%s3827_s3 + $0x348] sm:$0xff] }
 0x1fa   : > { %2253 = vmatprep.subr.mxu0 %v2530_v14 }
 0x1fb   : > { %2254 = vmatpush3.msra.mxu0 %v1849_v63  ;;  %v1333_v63 = vld [vmem:[%s3827_s3 + $0x318] sm:$0xff] }
 0x1fc   : > { %2255 = vmatprep.subr.mxu0 %v2530_v14 }
 0x1fd   : > { %2256 = vmatpush3.msra.mxu0 %v1848_v0  ;;  %v1332_v0 = vld [vmem:[%s3827_s3 + $0x310] sm:$0xff] }
 0x1fe   : > { %2257 = vmatprep.subr.mxu0 %v2530_v14 }
 0x1ff   : > { %2258 = vmatpush3.msra.mxu0 %v1847_v1  ;;  %v1326_v1 = vld [vmem:[%s3827_s3 + $0x2e0] sm:$0xff] }
 0x200   : > { %2259 = vmatprep.subr.mxu0 %v2530_v14 }
 0x201   : > { %2260 = vmatpush3.msra.mxu0 %v1846_v2  ;;  %v1325_v2 = vld [vmem:[%s3827_s3 + $0x2d8] sm:$0xff] }
 0x202   : > { %2261 = vmatprep.subr.mxu0 %v2530_v14 }
 0x203   : > { %2262 = vmatpush3.msra.mxu0 %v1845_v3  ;;  %v1319_v3 = vld [vmem:[%s3827_s3 + $0x2a8] sm:$0xff] }
 0x204   : > { %2263 = vmatprep.subr.mxu0 %v2530_v14 }
 0x205   : > { %2264 = vmatpush3.msra.mxu0 %v1844_v10  ;;  %v1298_v10 = vld [vmem:[%s3827_s3 + $0x200] sm:$0xff] }
 0x206   : > { %2265 = vmatprep.subr.mxu0 %v2530_v14 }
 0x207   : > { %2266 = vmatpush3.msra.mxu0 %v1843_v11  ;;  %v1297_v11 = vld [vmem:[%s3827_s3 + $0x1f8] sm:$0xff] }
 0x208   : > { %2305 = vmatprep.subr.mxu0 %v2530_v14 }
 0x2a8   : > { %v861_v6 = vpop.f32.mrf.mxu0 }
 0x2a9   : > { %v862_v7 = vadd.f32 %v861_v6, %v794_v5  ;;  %v1318_v5 = vld [vmem:[%s3827_s3 + $0x2a0] sm:$0xff]  ;;  %v1312_v6 = vld [vmem:[%s3827_s3 + $0x270] sm:$0xff] }
 0x2aa   : > { %v2199_v8 = vpop.f32.mrf.mxu0 }
 0x2ab   : > { %v865_v9 = vmax.f32 %v862_v7, 0.0  ;;  %v1311_v7 = vld [vmem:[%s3827_s3 + $0x268] sm:$0xff]  ;;  %v1305_v8 = vld [vmem:[%s3827_s3 + $0x238] sm:$0xff] }
 0x2ad   : > { %2233 = vmatmul.mubr.f32.vlgmr.msra.gmra.mxu1 %v865_v9  ;;  %v1304_v9 = vld [vmem:[%s3827_s3 + $0x230] sm:$0xff] }
 0x2ae   : > { %2302 = vmatprep.mubr.msk.f32.mxu1 %vm2531_vm1, %v2530_v14  ;;  %2271 = vmatpush3.msra.mxu1 %v1874_v13  ;;  %v1291_v13 = vld [vmem:[%s3827_s3 + $0x1c8] sm:$0xff] }
 0x2af   : > { %2272 = vmatprep.subr.mxu1 %v2530_v14 }
 0x2b0   : > { %2273 = vmatpush3.msra.mxu1 %v1873_v17  ;;  %v1290_v17 = vld [vmem:[%s3827_s3 + $0x1c0] sm:$0xff] }
 0x2b1   : > { %2274 = vmatprep.subr.mxu1 %v2530_v14 }
 0x2b2   : > { %2275 = vmatpush3.msra.mxu1 %v1872_v18  ;;  %v1284_v18 = vld [vmem:[%s3827_s3 + $0x190] sm:$0xff] }
 0x2b3   : > { %2276 = vmatprep.subr.mxu1 %v2530_v14 }
 0x2b4   : > { %2277 = vmatpush3.msra.mxu1 %v1871_v19  ;;  %v1283_v19 = vld [vmem:[%s3827_s3 + $0x188] sm:$0xff] }
 0x2b5   : > { %2278 = vmatprep.subr.mxu1 %v2530_v14 }
 0x2b6   : > { %2279 = vmatpush3.msra.mxu1 %v1870_v20  ;;  %v1277_v20 = vld [vmem:[%s3827_s3 + $0x158] sm:$0xff] }
 0x2b7   : > { %2280 = vmatprep.subr.mxu1 %v2530_v14 }
 0x2b8   : > { %2281 = vmatpush3.msra.mxu1 %v1869_v21  ;;  %v1276_v21 = vld [vmem:[%s3827_s3 + $0x150] sm:$0xff] }
 0x2b9   : > { %2282 = vmatprep.subr.mxu1 %v2530_v14 }
 0x2ba   : > { %2283 = vmatpush3.msra.mxu1 %v1868_v22  ;;  %v1270_v22 = vld [vmem:[%s3827_s3 + $0x120] sm:$0xff] }
 0x2bb   : > { %2284 = vmatprep.subr.mxu1 %v2530_v14 }
 0x2bc   : > { %2285 = vmatpush3.msra.mxu1 %v1867_v23  ;;  %v1269_v23 = vld [vmem:[%s3827_s3 + $0x118] sm:$0xff] }
 0x2bd   : > { %2286 = vmatprep.subr.mxu1 %v2530_v14 }
 0x2be   : > { %2287 = vmatpush3.msra.mxu1 %v1866_v24  ;;  %v1263_v24 = vld [vmem:[%s3827_s3 + $0xe8] sm:$0xff] }
 0x2bf   : > { %2288 = vmatprep.subr.mxu1 %v2530_v14 }
 0x2c0   : > { %2289 = vmatpush3.msra.mxu1 %v1865_v25  ;;  %v1262_v25 = vld [vmem:[%s3827_s3 + $0xe0] sm:$0xff] }
 0x2c1   : > { %2290 = vmatprep.subr.mxu1 %v2530_v14 }
 0x2c2   : > { %2291 = vmatpush3.msra.mxu1 %v1864_v26  ;;  %v1256_v26 = vld [vmem:[%s3827_s3 + $0xb0] sm:$0xff] }
 0x2c3   : > { %2292 = vmatprep.subr.mxu1 %v2530_v14 }
 0x2c4   : > { %2293 = vmatpush3.msra.mxu1 %v1863_v27  ;;  %v1255_v27 = vld [vmem:[%s3827_s3 + $0xa8] sm:$0xff] }
 0x2c5   : > { %2294 = vmatprep.subr.mxu1 %v2530_v14 }
 0x2c6   : > { %2295 = vmatpush3.msra.mxu1 %v1862_v28  ;;  %v1249_v28 = vld [vmem:[%s3827_s3 + $0x78] sm:$0xff] }
 0x2c7   : > { %2296 = vmatprep.subr.mxu1 %v2530_v14 }
 0x2c8   : > { %2297 = vmatpush3.msra.mxu1 %v1861_v34 }
 0x2c9   : > { %2298 = vmatprep.subr.mxu1 %v2530_v14 }
 0x2ca   : > { %2299 = vmatpush3.msra.mxu1 %v1860_v35 }
 0x2cb   : > { %2300 = vmatprep.subr.mxu1 %v2530_v14 }
 0x2cc   : > { %2301 = vmatpush3.msra.mxu1 %v1859_v36 }
 0x2cd   : > { %1383 = vmatprep.subr.mxu1 %v1340_v60  ;;  %v1265_v60 = vld [vmem:[%s3827_s3 + $0xf8] sm:$0xff] }
 0x36d   : > { %v953_v31 = vpop.f32.mrf.mxu1 }
 0x36e   : > { %v954_v32 = vadd.f32 %v953_v31, %v886_v30  ;;  %v1248_v30 = vld [vmem:[%s3827_s3 + $0x70] sm:$0xff]  ;;  %v1069_v31 = vsub.s32 5, %v3062_v12 }
 0x36f   : > { %v2234_v33 = vpop.f32.mrf.mxu1 }
 0x370   : > { %957 = vst [vmem:[%s3287_s17] sm:$0xff] %v954_v32  ;;  %2268 = vmatmul.mubr.f32.vlgmr.msra.gmra.mxu0 %v954_v32  ;;  %v1070_v32 = vrot.slane %v3068_v16, %v1069_v31 }
 0x371   : > { %2337 = vmatprep.mubr.msk.f32.mxu0 %vm2531_vm1, %v2530_v14  ;;  %2306 = vmatpush3.msra.mxu0 %v1890_v37  ;;  %v1341_v37 = vld [vmem:[%s3827_s3 + $0x358] sm:$0xff] }
 0x372   : > { %2307 = vmatprep.subr.mxu0 %v2530_v14 }
 0x373   : > { %2308 = vmatpush3.msra.mxu0 %v1889_v38  ;;  %v1335_v38 = vld [vmem:[%s3827_s3 + $0x328] sm:$0xff] }
 0x374   : > { %2309 = vmatprep.subr.mxu0 %v2530_v14 }
 0x375   : > { %2310 = vmatpush3.msra.mxu0 %v1888_v39  ;;  %v1334_v39 = vld [vmem:[%s3827_s3 + $0x320] sm:$0xff] }
 0x376   : > { %2311 = vmatprep.subr.mxu0 %v2530_v14 }
 0x377   : > { %2312 = vmatpush3.msra.mxu0 %v1887_v40  ;;  %v1328_v40 = vld [vmem:[%s3827_s3 + $0x2f0] sm:$0xff] }
 0x378   : > { %2313 = vmatprep.subr.mxu0 %v2530_v14 }
 0x379   : > { %2314 = vmatpush3.msra.mxu0 %v1886_v41  ;;  %v1327_v41 = vld [vmem:[%s3827_s3 + $0x2e8] sm:$0xff] }
 0x37a   : > { %2315 = vmatprep.subr.mxu0 %v2530_v14 }
 0x37b   : > { %2316 = vmatpush3.msra.mxu0 %v1885_v42  ;;  %v1321_v42 = vld [vmem:[%s3827_s3 + $0x2b8] sm:$0xff] }
 0x37c   : > { %2317 = vmatprep.subr.mxu0 %v2530_v14 }
 0x37d   : > { %2318 = vmatpush3.msra.mxu0 %v1884_v43  ;;  %v1320_v43 = vld [vmem:[%s3827_s3 + $0x2b0] sm:$0xff] }
 0x37e   : > { %2319 = vmatprep.subr.mxu0 %v2530_v14 }
 0x37f   : > { %2320 = vmatpush3.msra.mxu0 %v1883_v44  ;;  %v1314_v44 = vld [vmem:[%s3827_s3 + $0x280] sm:$0xff] }
 0x380   : > { %2321 = vmatprep.subr.mxu0 %v2530_v14 }
 0x381   : > { %2322 = vmatpush3.msra.mxu0 %v1882_v46  ;;  %v1313_v46 = vld [vmem:[%s3827_s3 + $0x278] sm:$0xff] }
 0x382   : > { %2323 = vmatprep.subr.mxu0 %v2530_v14 }
 0x383   : > { %2324 = vmatpush3.msra.mxu0 %v1881_v47  ;;  %v1307_v47 = vld [vmem:[%s3827_s3 + $0x248] sm:$0xff] }
 0x384   : > { %2325 = vmatprep.subr.mxu0 %v2530_v14 }
 0x385   : > { %2326 = vmatpush3.msra.mxu0 %v1880_v48  ;;  %v1306_v48 = vld [vmem:[%s3827_s3 + $0x240] sm:$0xff] }
 0x386   : > { %2327 = vmatprep.subr.mxu0 %v2530_v14 }
 0x387   : > { %2328 = vmatpush3.msra.mxu0 %v1879_v49  ;;  %v1300_v49 = vld [vmem:[%s3827_s3 + $0x210] sm:$0xff] }
 0x388   : > { %2329 = vmatprep.subr.mxu0 %v2530_v14 }
 0x389   : > { %2330 = vmatpush3.msra.mxu0 %v1878_v50  ;;  %v1299_v50 = vld [vmem:[%s3827_s3 + $0x208] sm:$0xff] }
 0x38a   : > { %2331 = vmatprep.subr.mxu0 %v2530_v14 }
 0x38b   : > { %2332 = vmatpush3.msra.mxu0 %v1877_v57  ;;  %v1278_v57 = vld [vmem:[%s3827_s3 + $0x160] sm:$0xff] }
 0x38c   : > { %2333 = vmatprep.subr.mxu0 %v2530_v14 }
 0x38d   : > { %2334 = vmatpush3.msra.mxu0 %v1876_v58  ;;  %v1272_v58 = vld [vmem:[%s3827_s3 + $0x130] sm:$0xff] }
 0x38e   : > { %2335 = vmatprep.subr.mxu0 %v2530_v14 }
 0x38f   : > { %2336 = vmatpush3.msra.mxu0 %v1875_v59  ;;  %v1271_v59 = vld [vmem:[%s3827_s3 + $0x128] sm:$0xff] }
 0x390   : > { %1454 = vmatprep.subr.mxu0 %v1342_v61  ;;  %v1264_v61 = vld [vmem:[%s3827_s3 + $0xf0] sm:$0xff] }
 0x430   : > { %v1045_v53 = vpop.f32.mrf.mxu0 }
 0x431   : > { %v1046_v54 = vadd.f32 %v1045_v53, %v978_v52  ;;  %v1293_v52 = vld [vmem:[%s3827_s3 + $0x1d8] sm:$0xff]  ;;  %v1292_v53 = vld [vmem:[%s3827_s3 + $0x1d0] sm:$0xff] }
 0x432   : > { %v2269_v55 = vpop.f32.mrf.mxu0 }
 0x433   : > { %v1049_v56 = vmax.f32 %v1046_v54, 0.0  ;;  %v1286_v54 = vld [vmem:[%s3827_s3 + $0x1a0] sm:$0xff]  ;;  %v1285_v55 = vld [vmem:[%s3827_s3 + $0x198] sm:$0xff] }
 0x435   : > { %2303 = vmatmul.mubr.f32.vlgmr.msra.gmra.mxu1 %v1049_v56  ;;  %v1279_v56 = vld [vmem:[%s3827_s3 + $0x168] sm:$0xff] }
 0x436   : > { %1447 = vmatprep.mubr.f32.mxu1 %v2530_v14  ;;  %1384 = vmatpush1.msra.mxu1 %v1339_v62  ;;  %v1258_v62 = vld [vmem:[%s3827_s3 + $0xc0] sm:$0xff] }
 0x437   : > { %1385 = vmatprep.subr.mxu1 %v1333_v63  ;;  %v1257_v63 = vld [vmem:[%s3827_s3 + $0xb8] sm:$0xff] }
 0x438   : > { %1386 = vmatpush1.msra.mxu1 %v1332_v0  ;;  %v1251_v0 = vld [vmem:[%s3827_s3 + $0x88] sm:$0xff] }
 0x439   : > { %1387 = vmatprep.subr.mxu1 %v1326_v1  ;;  %v1250_v1 = vld [vmem:[%s3827_s3 + $0x80] sm:$0xff] }
 0x43a   : > { %1388 = vmatpush1.msra.mxu1 %v1325_v2  ;;  %v1242_v2 = vld [vmem:[%s3827_s3 + $0x40] sm:$0xff] }
 0x43b   : > { %1389 = vmatprep.subr.mxu1 %v1319_v3  ;;  %v1244_v3 = vld [vmem:[%s3827_s3 + $0x50] sm:$0xff] }
 0x43c   : > { %1390 = vmatpush1.msra.mxu1 %v1318_v5  ;;  %v1241_v5 = vld [vmem:[%s3827_s3 + $0x38] sm:$0xff] }
 0x43d   : > { %1391 = vmatprep.subr.mxu1 %v1312_v6  ;;  %v1243_v6 = vld [vmem:[%s3827_s3 + $0x48] sm:$0xff] }
 0x43e   : > { %1392 = vmatpush1.msra.mxu1 %v1311_v7  ;;  %v1235_v7 = vld [vmem:[%s3827_s3 + $0x8] sm:$0xff] }
 0x43f   : > { %1393 = vmatprep.subr.mxu1 %v1305_v8  ;;  %v1237_v8 = vld [vmem:[%s3827_s3 + $0x18] sm:$0xff] }
 0x440   : > { %1394 = vmatpush1.msra.mxu1 %v1304_v9  ;;  %v1234_v9 = vld [vmem:[%s3827_s3] sm:$0xff] }
 0x441   : > { %1395 = vmatprep.subr.mxu1 %v1298_v10  ;;  %v1236_v10 = vld [vmem:[%s3827_s3 + $0x10] sm:$0xff] }
 0x442   : > { %1396 = vmatpush1.msra.mxu1 %v1297_v11  ;;  %v1344_v11 = vld [vmem:[%s3827_s3 + $0x370] sm:$0xff] }
 0x443   : > { %1397 = vmatprep.subr.mxu1 %v1291_v13  ;;  %v1161_v13 = vsub.s32 6, %v3062_v12 }
 0x444   : > { %1398 = vmatpush1.msra.mxu1 %v1290_v17 }
 0x445   : > { %1399 = vmatprep.subr.mxu1 %v1284_v18  ;;  %v1162_v17 = vrot.slane %v3068_v16, %v1161_v13  ;;  %v1336_v16 = vld [vmem:[%s3827_s3 + $0x330] sm:$0xff] }
 0x446   : > { %1400 = vmatpush1.msra.mxu1 %v1283_v19 }
 0x447   : > { %1401 = vmatprep.subr.mxu1 %v1277_v20 }
 0x448   : > { %1402 = vmatpush1.msra.mxu1 %v1276_v21 }
 0x449   : > { %1403 = vmatprep.subr.mxu1 %v1270_v22  ;;  %v1343_v22 = vld [vmem:[%s3827_s3 + $0x368] sm:$0xff] }
 0x44a   : > { %1404 = vmatpush1.msra.mxu1 %v1269_v23  ;;  %v1345_v23 = vld [vmem:[%s3827_s3 + $0x378] sm:$0xff] }
 0x44b   : > { %1405 = vmatprep.subr.mxu1 %v1263_v24  ;;  %v1337_v24 = vld [vmem:[%s3827_s3 + $0x338] sm:$0xff] }
 0x44c   : > { %1406 = vmatpush1.msra.mxu1 %v1262_v25  ;;  %v1338_v25 = vld [vmem:[%s3827_s3 + $0x340] sm:$0xff] }
 0x44d   : > { %1407 = vmatprep.subr.mxu1 %v1256_v26  ;;  %v1330_v26 = vld [vmem:[%s3827_s3 + $0x300] sm:$0xff] }
 0x44e   : > { %1408 = vmatpush1.msra.mxu1 %v1255_v27  ;;  %v1329_v27 = vld [vmem:[%s3827_s3 + $0x2f8] sm:$0xff] }
 0x44f   : > { %1409 = vmatprep.subr.mxu1 %v1249_v28  ;;  %v1331_v28 = vld [vmem:[%s3827_s3 + $0x308] sm:$0xff] }
 0x450   : > { %1410 = vmatpush1.msra.mxu1 %v1248_v30  ;;  %v1323_v30 = vld [vmem:[%s3827_s3 + $0x2c8] sm:$0xff] }
 0x451   : > { %1411 = vmatprep.subr.mxu1 %v1242_v2  ;;  %v1246_v2 = vld [vmem:[%s3827_s3 + $0x60] sm:$0xff] }
 0x452   : > { %1412 = vmatpush1.msra.mxu1 %v1241_v5  ;;  %v1247_v5 = vld [vmem:[%s3827_s3 + $0x68] sm:$0xff] }
 0x453   : > { %1413 = vmatprep.subr.mxu1 %v1235_v7  ;;  %v1238_v7 = vld [vmem:[%s3827_s3 + $0x20] sm:$0xff] }
 0x454   : > { %1414 = vmatpush1.msra.mxu1 %v1234_v9 }
 0x455   : > { %1525 = vmatprep.subr.mxu1 %v1344_v11 }
 0x4f5   : > { %v1137_v33 = vpop.f32.mrf.mxu1 }
 0x4f6   : > { %v1138_v34 = vadd.f32 %v1137_v33, %v1070_v32  ;;  %v1322_v32 = vld [vmem:[%s3827_s3 + $0x2c0] sm:$0xff]  ;;  %v1324_v33 = vld [vmem:[%s3827_s3 + $0x2d0] sm:$0xff] }
 0x4f7   : > { %v2304_v35 = vpop.f32.mrf.mxu1 }
 0x4f8   : > { %v1141_v36 = vmax.f32 %v1138_v34, 0.0  ;;  %v1316_v34 = vld [vmem:[%s3827_s3 + $0x290] sm:$0xff]  ;;  %v1315_v35 = vld [vmem:[%s3827_s3 + $0x288] sm:$0xff] }
 0x4fa   : > { %2338 = vmatmul.mubr.f32.vlgmr.msra.gmra.mxu0 %v1141_v36  ;;  %v1317_v36 = vld [vmem:[%s3827_s3 + $0x298] sm:$0xff] }
 0x4fb   : > { %1455 = vmatpush1.msra.mxu0 %v1341_v37  ;;  %1518 = vmatprep.mubr.f32.mxu0 %v2530_v14  ;;  %v1309_v37 = vld [vmem:[%s3827_s3 + $0x258] sm:$0xff] }
 0x4fc   : > { %1456 = vmatprep.subr.mxu0 %v1335_v38  ;;  %v1308_v38 = vld [vmem:[%s3827_s3 + $0x250] sm:$0xff] }
 0x4fd   : > { %1457 = vmatpush1.msra.mxu0 %v1334_v39  ;;  %v1310_v39 = vld [vmem:[%s3827_s3 + $0x260] sm:$0xff] }
 0x4fe   : > { %1458 = vmatprep.subr.mxu0 %v1328_v40  ;;  %v1302_v40 = vld [vmem:[%s3827_s3 + $0x220] sm:$0xff] }
 0x4ff   : > { %1459 = vmatpush1.msra.mxu0 %v1327_v41  ;;  %v1301_v41 = vld [vmem:[%s3827_s3 + $0x218] sm:$0xff] }
 0x500   : > { %1460 = vmatprep.subr.mxu0 %v1321_v42  ;;  %v1303_v42 = vld [vmem:[%s3827_s3 + $0x228] sm:$0xff] }
 0x501   : > { %1461 = vmatpush1.msra.mxu0 %v1320_v43  ;;  %v1295_v43 = vld [vmem:[%s3827_s3 + $0x1e8] sm:$0xff] }
 0x502   : > { %1462 = vmatprep.subr.mxu0 %v1314_v44  ;;  %v1294_v44 = vld [vmem:[%s3827_s3 + $0x1e0] sm:$0xff] }
 0x503   : > { %1463 = vmatpush1.msra.mxu0 %v1313_v46  ;;  %v1296_v46 = vld [vmem:[%s3827_s3 + $0x1f0] sm:$0xff] }
 0x504   : > { %1464 = vmatprep.subr.mxu0 %v1307_v47  ;;  %v1288_v47 = vld [vmem:[%s3827_s3 + $0x1b0] sm:$0xff] }
 0x505   : > { %1465 = vmatpush1.msra.mxu0 %v1306_v48  ;;  %v1287_v48 = vld [vmem:[%s3827_s3 + $0x1a8] sm:$0xff] }
 0x506   : > { %1466 = vmatprep.subr.mxu0 %v1300_v49  ;;  %v1289_v49 = vld [vmem:[%s3827_s3 + $0x1b8] sm:$0xff] }
 0x507   : > { %1467 = vmatpush1.msra.mxu0 %v1299_v50  ;;  %v1281_v50 = vld [vmem:[%s3827_s3 + $0x178] sm:$0xff] }
 0x508   : > { %1468 = vmatprep.subr.mxu0 %v1293_v52  ;;  %v1280_v52 = vld [vmem:[%s3827_s3 + $0x170] sm:$0xff] }
 0x509   : > { %1469 = vmatpush1.msra.mxu0 %v1292_v53  ;;  %v1282_v53 = vld [vmem:[%s3827_s3 + $0x180] sm:$0xff] }
 0x50a   : > { %1470 = vmatprep.subr.mxu0 %v1286_v54  ;;  %v1274_v54 = vld [vmem:[%s3827_s3 + $0x140] sm:$0xff] }
 0x50b   : > { %1471 = vmatpush1.msra.mxu0 %v1285_v55  ;;  %v1273_v55 = vld [vmem:[%s3827_s3 + $0x138] sm:$0xff] }
 0x50c   : > { %1472 = vmatprep.subr.mxu0 %v1279_v56  ;;  %v1275_v56 = vld [vmem:[%s3827_s3 + $0x148] sm:$0xff] }
 0x50d   : > { %1473 = vmatpush1.msra.mxu0 %v1278_v57  ;;  %v1267_v57 = vld [vmem:[%s3827_s3 + $0x108] sm:$0xff] }
 0x50e   : > { %1474 = vmatprep.subr.mxu0 %v1272_v58  ;;  %v1266_v58 = vld [vmem:[%s3827_s3 + $0x100] sm:$0xff] }
 0x50f   : > { %1475 = vmatpush1.msra.mxu0 %v1271_v59  ;;  %v1268_v59 = vld [vmem:[%s3827_s3 + $0x110] sm:$0xff] }
 0x510   : > { %1476 = vmatprep.subr.mxu0 %v1265_v60  ;;  %v1260_v60 = vld [vmem:[%s3827_s3 + $0xd0] sm:$0xff] }
 0x511   : > { %1477 = vmatpush1.msra.mxu0 %v1264_v61  ;;  %v1259_v61 = vld [vmem:[%s3827_s3 + $0xc8] sm:$0xff] }
 0x512   : > { %1478 = vmatprep.subr.mxu0 %v1258_v62  ;;  %v1261_v62 = vld [vmem:[%s3827_s3 + $0xd8] sm:$0xff] }
 0x513   : > { %1479 = vmatpush1.msra.mxu0 %v1257_v63  ;;  %v1253_v63 = vld [vmem:[%s3827_s3 + $0x98] sm:$0xff] }
 0x514   : > { %1480 = vmatprep.subr.mxu0 %v1251_v0  ;;  %v1252_v0 = vld [vmem:[%s3827_s3 + $0x90] sm:$0xff] }
 0x515   : > { %1481 = vmatpush1.msra.mxu0 %v1250_v1  ;;  %v1254_v1 = vld [vmem:[%s3827_s3 + $0xa0] sm:$0xff] }
 0x516   : > { %1482 = vmatprep.subr.mxu0 %v1244_v3  ;;  %v1245_v3 = vld [vmem:[%s3827_s3 + $0x58] sm:$0xff] }
 0x517   : > { %1483 = vmatpush1.msra.mxu0 %v1243_v6  ;;  %v1239_v6 = vld [vmem:[%s3827_s3 + $0x28] sm:$0xff] }
 0x518   : > { %1484 = vmatprep.subr.mxu0 %v1237_v8  ;;  %v1240_v8 = vld [vmem:[%s3827_s3 + $0x30] sm:$0xff] }
 0x519   : > { %1485 = vmatpush1.msra.mxu0 %v1236_v10 }
 0x51a   : > { %2340 = vmatprep.subr.mxu0 %v2530_v14 }
 0x5ba   : > { %v1229_v18 = vpop.f32.mrf.mxu0 }
 0x5bb   : > { %v1230_v19 = vadd.f32 %v1229_v18, %v1162_v17 }
 0x5bc   : > { %v2339_v20 = vpop.f32.mrf.mxu0 }
 0x5bd   : > { %v3576_v21 = vmax.f32 %v1230_v19, 0.0 }
 0x5bf   : > { %1448 = vmatmul.mubr.f32.vlgmr.msra.gmra.mxu1 %v3576_v21  ;;  %1519 = vmatmul.mubr.f32.vlgmr.msra.gmra.mxu0 %v3576_v21 }
 0x5c0   : > { %1526 = vmatpush1.msra.mxu1 %v1343_v22  ;;  %2341 = vmatpush3.msra.mxu0 %v1345_v23 }
 0x5c1   : > { %1527 = vmatprep.subr.mxu1 %v1337_v24  ;;  %2342 = vmatprep.subr.mxu0 %v2530_v14 }
 0x5c2   : > { %1528 = vmatpush1.msra.mxu1 %v1336_v16  ;;  %2343 = vmatpush3.msra.mxu0 %v1338_v25 }
 0x5c3   : > { %1529 = vmatprep.subr.mxu1 %v1330_v26  ;;  %2344 = vmatprep.subr.mxu0 %v2530_v14 }
 0x5c4   : > { %1530 = vmatpush1.msra.mxu1 %v1329_v27  ;;  %2345 = vmatpush3.msra.mxu0 %v1331_v28 }
 0x5c5   : > { %1531 = vmatprep.subr.mxu1 %v1323_v30  ;;  %2346 = vmatprep.subr.mxu0 %v2530_v14 }
 0x5c6   : > { %1532 = vmatpush1.msra.mxu1 %v1322_v32  ;;  %2347 = vmatpush3.msra.mxu0 %v1324_v33 }
 0x5c7   : > { %1533 = vmatprep.subr.mxu1 %v1316_v34  ;;  %2348 = vmatprep.subr.mxu0 %v2530_v14 }
 0x5c8   : > { %1534 = vmatpush1.msra.mxu1 %v1315_v35  ;;  %2349 = vmatpush3.msra.mxu0 %v1317_v36 }
 0x5c9   : > { %1535 = vmatprep.subr.mxu1 %v1309_v37  ;;  %2350 = vmatprep.subr.mxu0 %v2530_v14 }
 0x5ca   : > { %1536 = vmatpush1.msra.mxu1 %v1308_v38  ;;  %2351 = vmatpush3.msra.mxu0 %v1310_v39 }
 0x5cb   : > { %1537 = vmatprep.subr.mxu1 %v1302_v40  ;;  %2352 = vmatprep.subr.mxu0 %v2530_v14 }
 0x5cc   : > { %1538 = vmatpush1.msra.mxu1 %v1301_v41  ;;  %2353 = vmatpush3.msra.mxu0 %v1303_v42 }
 0x5cd   : > { %1539 = vmatprep.subr.mxu1 %v1295_v43  ;;  %2354 = vmatprep.subr.mxu0 %v2530_v14 }
 0x5ce   : > { %1540 = vmatpush1.msra.mxu1 %v1294_v44  ;;  %2355 = vmatpush3.msra.mxu0 %v1296_v46 }
 0x5cf   : > { %1541 = vmatprep.subr.mxu1 %v1288_v47  ;;  %2356 = vmatprep.subr.mxu0 %v2530_v14 }
 0x5d0   : > { %1542 = vmatpush1.msra.mxu1 %v1287_v48  ;;  %2357 = vmatpush3.msra.mxu0 %v1289_v49 }
 0x5d1   : > { %1543 = vmatprep.subr.mxu1 %v1281_v50  ;;  %2358 = vmatprep.subr.mxu0 %v2530_v14 }
 0x5d2   : > { %1544 = vmatpush1.msra.mxu1 %v1280_v52  ;;  %2359 = vmatpush3.msra.mxu0 %v1282_v53 }
 0x5d3   : > { %1545 = vmatprep.subr.mxu1 %v1274_v54  ;;  %2360 = vmatprep.subr.mxu0 %v2530_v14 }
 0x5d4   : > { %1546 = vmatpush1.msra.mxu1 %v1273_v55  ;;  %2361 = vmatpush3.msra.mxu0 %v1275_v56 }
 0x5d5   : > { %1547 = vmatprep.subr.mxu1 %v1267_v57  ;;  %2362 = vmatprep.subr.mxu0 %v2530_v14 }
 0x5d6   : > { %1548 = vmatpush1.msra.mxu1 %v1266_v58  ;;  %2363 = vmatpush3.msra.mxu0 %v1268_v59 }
 0x5d7   : > { %1549 = vmatprep.subr.mxu1 %v1260_v60  ;;  %2364 = vmatprep.subr.mxu0 %v2530_v14 }
 0x5d8   : > { %1550 = vmatpush1.msra.mxu1 %v1259_v61  ;;  %2365 = vmatpush3.msra.mxu0 %v1261_v62 }
 0x5d9   : > { %1551 = vmatprep.subr.mxu1 %v1253_v63  ;;  %2366 = vmatprep.subr.mxu0 %v2530_v14 }
 0x5da   : > { %1552 = vmatpush1.msra.mxu1 %v1252_v0  ;;  %2367 = vmatpush3.msra.mxu0 %v1254_v1 }
 0x5db   : > { %1553 = vmatprep.subr.mxu1 %v1246_v2  ;;  %2368 = vmatprep.subr.mxu0 %v2530_v14 }
 0x5dc   : > { %1554 = vmatpush1.msra.mxu1 %v1245_v3  ;;  %2369 = vmatpush3.msra.mxu0 %v1247_v5 }
 0x5dd   : > { %1555 = vmatprep.subr.mxu1 %v1239_v6  ;;  %2370 = vmatprep.subr.mxu0 %v2530_v14 }
 0x5de   : > { %1556 = vmatpush1.msra.mxu1 %v1238_v7  ;;  %1589 = vmatprep.mubr.f32.mxu1 %v2530_v14 }
 0x5df   : > { %2371 = vmatpush3.msra.mxu0 %v1240_v8  ;;  %2372 = vmatprep.mubr.msk.f32.mxu0 %vm2531_vm1, %v2530_v14 }
 0x5e0   : > { %1590 = vmatmul.mubr.f32.vlgmr.msra.gmra.mxu1 %v3576_v21  ;;  %2373 = vmatmul.mubr.f32.vlgmr.msra.gmra.mxu0 %v3576_v21 }
 0x5e1   : > { %2451 = shalt.err (!%p2448_p3)
}
 0x5e2   : > { %s2452_s29 = scalar_lea.hbm %s1697_s18, 128  ;;  %s2456_s13 = scalar_lea.hbm %s3830_s6, 256 }
 0x5e3   : > { %p2453_p4 = scmp.ne.s32.totalorder %s1697_s18, %s2452_s29  ;;  %p2457_p9 = scmp.lt.s32.totalorder %s1697_s18, %s3830_s6 }
 0x5e4   : > { %p2458_p10 = scmp.lt.s32.totalorder %s2456_s13, %s2452_s29 }
 0x5e5   : > { %p2454_p7 = pnand %p2453_p4, %p2612_p5 }
 0x5e6   : > { %p2459_p11 = por %p2458_p10, %p2457_p9 }
 0x5e7   : > { %p2455_p8 = pneg %p2454_p7 }
 0x5e9   : > { %p2460_p12 = pnand %p2459_p11, %p2455_p8 }
 0x5eb   : > { %2463 = shalt.err (!%p2460_p12)
}
 0x5ec   : > { %2378 = dma.vmem_to_hbm [thread:$0]  (%p2612_p5), %s1700_s19, 128, %s1697_s18, %s1681_s21   ;;  %v1346_v14 = vld [vmem:[%s3829_s5] sm:$0x7f] }
 0x5ed   : > { %v1351_v9 = vrot.slane %v1346_v14, %v396_v15  ;;  %v1359_v10 = vrot.slane %v1346_v14, %v793_v4  ;;  %v1355_v11 = vrot.slane %v1346_v14, %v701_v45  ;;  %v1363_v17 = vrot.slane %v1346_v14, %v885_v29  ;;  %s2375_s18 = smul.u32 56, %s3281_s14  ;;  %s1686_s9 = scalar_lea.sflag [#allocation5], %s3281_s14 }
 0x5ee   : > { %v1367_v25 = vrot.slane %v1346_v14, %v977_v51  ;;  %v1375_v26 = vrot.slane %v1346_v14, %v1161_v13  ;;  %v1371_v27 = vrot.slane %v1346_v14, %v1069_v31  ;;  %s2377_s21 = smul.u32 896, %s2595_s28  ;;  %s2533_s13 = smov [#allocation4]  }
 0x5ef   : > { %s282_s19 = scalar_lea.vmem [#allocation4], %s2375_s18  ;;  %s2468_s15 = sshll.u32 %s2533_s13, 4  ;;  %s2469_s15 = int_to_ptr.vmem [resolvable:$false] %s2468_s15 }
 0x5f0   : > { %s1713_s23 = sshll.u32 %s282_s19, 4  ;;  %s3781_s17 = scalar_lea.hbm %s3831_s7, %s2377_s21  ;;  %s3783_s23 = int_to_ptr.vmem [resolvable:$true] %s1713_s23 }
 0x5f1   : > { %s2464_s28 = scalar_lea.vmem %s3783_s23, 896  ;;  %s2470_s16 = scalar_lea.vmem %s2469_s15, 1792 }
 0x5f2   : > { %p2465_p13 = scmp.ne.s32.totalorder %s3783_s23, %s2464_s28  ;;  %p2471_p2 = scmp.lt.s32.totalorder %s3783_s23, %s2469_s15 }
 0x5f3   : > { %p2472_p3 = scmp.lt.s32.totalorder %s2470_s16, %s2464_s28 }
 0x5f4   : > { %p2466_p0 = pnand %p2465_p13, %p2612_p5 }
 0x5f5   : > { %p2473_p4 = por %p2472_p3, %p2471_p2 }
 0x5f6   : > { %p2467_p1 = pneg %p2466_p0 }
 0x5f8   : > { %p2474_p7 = pnand %p2473_p4, %p2467_p1 }
 0x67f   : > { %v1449_v18 = vpop.f32.mrf.mxu1  ;;  %v1520_v19 = vpop.f32.mrf.mxu0 }
 0x680   : > { %v1450_v20 = vadd.f32 %v1449_v18, %v1351_v9  ;;  %v1521_v21 = vadd.f32 %v1520_v19, %v1359_v10 }
 0x681   : > { %v1451_v22 = vpop.f32.mrf.mxu1  ;;  %v1522_v23 = vpop.f32.mrf.mxu0 }
 0x682   : > { %2424 = vtanh.f32 %v1450_v20  ;;  %v1452_v24 = vadd.f32 %v1451_v22, %v1355_v11  ;;  %v1523_v16 = vadd.f32 %v1522_v23, %v1363_v17 }
 0x683   : > { %2426 = vtanh.f32 %v1521_v21 }
 0x684   : > { %2428 = vtanh.f32 %v1452_v24 }
 0x685   : > { %2430 = vtanh.f32 %v1523_v16 }
 0x68f   : > { %v2425_v15 = vpop.eup %2424 }
 0x690   : > { %v2427_v4 = vpop.eup %2426  ;;  %1673 = vst [vmem:[%s282_s19] sm:$0xff] %v2425_v15 }
 0x691   : > { %v2429_v45 = vpop.eup %2428  ;;  %1675 = vst [vmem:[%s282_s19 + $0x10] sm:$0xff] %v2427_v4 }
 0x692   : > { %v2431_v29 = vpop.eup %2430  ;;  %1674 = vst [vmem:[%s282_s19 + $0x8] sm:$0xff] %v2429_v45 }
 0x693   : > { %1676 = vst [vmem:[%s282_s19 + $0x18] sm:$0xff] %v2431_v29 }
 0x6a0   : > { %v1591_v28 = vpop.f32.mrf.mxu1  ;;  %v1662_v30 = vpop.f32.mrf.mxu0 }
 0x6a1   : > { %v1592_v32 = vadd.f32 %v1591_v28, %v1367_v25  ;;  %v1663_v33 = vadd.f32 %v1662_v30, %v1375_v26 }
 0x6a2   : > { %v1593_v34 = vpop.f32.mrf.mxu1  ;;  %v2374_v35 = vpop.f32.mrf.mxu0 }
 0x6a3   : > { %2432 = vtanh.f32 %v1592_v32  ;;  %v1594_v36 = vadd.f32 %v1593_v34, %v1371_v27 }
 0x6a4   : > { %2434 = vtanh.f32 %v1663_v33 }
 0x6a5   : > { %2436 = vtanh.f32 %v1594_v36 }
 0x6b0   : > { %v2433_v51 = vpop.eup %2432 }
 0x6b1   : > { %v2435_v37 = vpop.eup %2434  ;;  %1677 = vst [vmem:[%s282_s19 + $0x20] sm:$0xff] %v2433_v51 }
 0x6b2   : > { %v2437_v12 = vpop.eup %2436  ;;  %1679 = vst.msk [vmem:[%s282_s19 + $0x30] sm:$0xff] %vm398_vm0, %v2435_v37 }
 0x6b3   : > { %1678 = vst [vmem:[%s282_s19 + $0x28] sm:$0xff] %v2437_v12 }
 0x6b4   : > { %2477 = shalt.err (!%p2474_p7)
}
 0x6b5   : > { %s2478_s20 = scalar_lea.hbm %s3781_s17, 896  ;;  %s2482_s18 = scalar_lea.hbm %s3831_s7, 1792 }
 0x6b6   : > { %p2479_p8 = scmp.ne.s32.totalorder %s3781_s17, %s2478_s20  ;;  %p2483_p11 = scmp.lt.s32.totalorder %s3781_s17, %s3831_s7 }
 0x6b7   : > { %p2484_p12 = scmp.lt.s32.totalorder %s2482_s18, %s2478_s20 }
 0x6b8   : > { %p2480_p9 = pnand %p2479_p8, %p2612_p5 }
 0x6b9   : > { %p2485_p13 = por %p2484_p12, %p2483_p11 }
 0x6ba   : > { %p2481_p10 = pneg %p2480_p9 }
 0x6bc   : > { %p2486_p0 = pnand %p2485_p13, %p2481_p10 }
 0x6be   : > { %2489 = shalt.err (!%p2486_p0)
}
 0x6bf   : > { %2379 = dma.vmem_to_hbm [thread:$0]  (%p2612_p5), %s3783_s23, 896, %s3781_s17, %s1686_s9  }
 0x6c0 PF: > { %p2389_p1 = scmp.ge.s32.totalorder %s2528_s27, 2  ;;  %s1725_s8 = sand.u32 1, %s2516_s24  }
 0x6c1   : > { %s1726_s29 = scalar_lea.sflag [#allocation3], %s1725_s8 }
 0x6c2   : > { %p2383_p2 = pnand %p2389_p1, %p2616_p6 }
 0x6c4   : > { %p2384_p3 = pneg %p2383_p2 }
 0x6c6   : > { %2507 = dma.done.wait (%p2384_p3), %s1726_s29, 128  }
 0x6c7   : > { %2509 = vsyncadd (%p2384_p3), %s1726_s29, 4294967168  ;;  %s1735_s28 = scalar_lea.sflag [#allocation5], %s1725_s8 }
 0x6c8   : > { %2511 = dma.done.wait (%p2384_p3), %s1735_s28, 896  }
 0x6c9   : > { %2513 = vsyncadd (%p2384_p3), %s1735_s28, 4294966400  ;;  %p21_p5 = scmp.ge.s32.totalorder %s2599_s30, 4   ;;  %s3834_s24 = smov %s2520_s25 }
 0x6ca   : > { %s3835_s25 = smov %s2524_s26  ;;  %s3836_s26 = smov %s2610_s10 }
 0x6cb   : > { %s3837_s27 = smov %s2599_s30  ;;  %23 = sbr.rel (!%p21_p5) target bundleno = 5 (0x5), region = 101 }
 0x6d0   :  { %1740 = vsyncpa [#allocation3], 1 }
 0x6d1   :  { %1742 = vsyncpa [#allocation3 + $0x1], 1 }
 0x6d2   :  { %1743 = vsyncpa [#allocation5], 1 }
 0x6d3   :  { %1745 = vsyncpa [#allocation5 + $0x1], 1 }

</bundles_post_ra>
